<compile_context>
chip_gen: v7x
topology: tpu7x:2x2x1
jax: 0.10.0
libtpu: 0.0.40
codegen_flags: <defaults>
</compile_context>

<pallas_src>
import functools

import numpy as np
import jax
import jax.numpy as jnp
from jax.experimental import pallas as pl
from jax.experimental.pallas import tpu as pltpu

# ----------------- small deterministic config -----------------
B = 2                 # batch
IN_CHANNELS = 4       # frequency bins
L = 32                # frames
FRAMES_PER_PATCH = 4  # -> P = 8 patches
EMBED_DIM = 32
NHEAD = 4
NUM_LAYERS = 2
NUM_CLASSES = 10
SELECTION_RATE = 0.25
CLUSTER_SIZE = 3
LN_EPS = 1e-5


# ----------------- in-kernel helpers -----------------
def _layer_norm(x, g, b):
    mu = jnp.mean(x, axis=-1, keepdims=True)
    var = jnp.mean((x - mu) ** 2, axis=-1, keepdims=True)
    return (x - mu) * jax.lax.rsqrt(var + LN_EPS) * g + b


def _fused_forward_kernel(data_ref, cslab_ref, pslab_ref, hslab_ref, y_ref,
                          *, nhead, num_layers, rpad, selp, d):
    D = d
    H = nhead
    R = rpad                      # padded sequence rows (== D here)
    FC = data_ref.shape[1]
    hd = D // H
    scale = 1.0 / float(np.sqrt(hd))

    # ---- const-slab row offsets (all multiples of 8 -> free aligned views) ----
    off_keep = 0
    off_addc = off_keep + R
    off_hmask = off_addc + R
    off_bias = off_hmask + H * R
    off_sel = off_bias + H * R

    def prow(start, size):
        return pslab_ref[pl.ds(start, size), :]

    # ---- in_proj + selection-mask zeroing + PE + cls append, all in one shot ----
    # data rows [0, B*P) hold the patches, the rest are zero; `addc` holds keep*in_b + PE for the
    # patch rows, the cls embedding for the cls rows and 0 for padding rows, so one matmul +
    # one multiply + one add produces the whole padded (R, D) input sequence.
    in_w = prow(0, FC)
    x = jnp.dot(data_ref[...], in_w, preferred_element_type=jnp.float32)
    x = x * cslab_ref[pl.ds(off_keep, R), :] + cslab_ref[pl.ds(off_addc, R), :]

    # ---- transformer encoder stack (post-norm, relu, eval-mode dropout) ----
    for l in range(num_layers):
        base = FC + l * (6 * D + 16)
        bb = base + 6 * D
        wq, wk, wv = prow(base, D), prow(base + D, D), prow(base + 2 * D, D)
        wo, w1, w2 = prow(base + 3 * D, D), prow(base + 4 * D, D), prow(base + 5 * D, D)
        bq, bk, bv, bo = prow(bb + 0, 1), prow(bb + 1, 1), prow(bb + 2, 1), prow(bb + 3, 1)
        b1, b2 = prow(bb + 4, 1), prow(bb + 5, 1)
        g1, be1, g2, be2 = prow(bb + 6, 1), prow(bb + 7, 1), prow(bb + 8, 1), prow(bb + 9, 1)

        q = jnp.dot(x, wq, preferred_element_type=jnp.float32) + bq        # (R, D)
        k = jnp.dot(x, wk, preferred_element_type=jnp.float32) + bk
        v = jnp.dot(x, wv, preferred_element_type=jnp.float32) + bv

        # Heads folded onto the row axis: rows [h*R, (h+1)*R) carry head h (q lane-masked to its
        # hd lanes), so ONE score matmul / softmax / PV matmul covers all heads; the precomputed
        # additive bias masks cross-batch and padding columns.
        hmask = cslab_ref[pl.ds(off_hmask, H * R), :]                      # (H*R, D)
        q_hm = jnp.concatenate([q] * H, axis=0) * hmask                    # (H*R, D)
        s = jax.lax.dot_general(q_hm, k, (((1,), (1,)), ((), ())),
                                preferred_element_type=jnp.float32)
        s = s * scale + cslab_ref[pl.ds(off_bias, H * R), :]               # (H*R, R)
        s = s - jnp.max(s, axis=-1, keepdims=True)
        e = jnp.exp(s)
        p = e * pl.reciprocal(jnp.sum(e, axis=-1, keepdims=True), approx=True)
        o_hm = jnp.dot(p, v, preferred_element_type=jnp.float32) * hmask   # (H*R, D)
        o = o_hm[0:R, :]
        for h_i in range(1, H):                                            # concat-heads == blockwise sum
            o = o + o_hm[h_i * R:(h_i + 1) * R, :]
        attn = jnp.dot(o, wo, preferred_element_type=jnp.float32) + bo

        x = _layer_norm(x + attn, g1, be1)
        ff = jnp.maximum(jnp.dot(x, w1, preferred_element_type=jnp.float32) + b1, 0.0)
        ff = jnp.dot(ff, w2, preferred_element_type=jnp.float32) + b2
        x = _layer_norm(x + ff, g2, be2)

    # ---- masked_select + pad_sequence (one-hot gather) + fused classifier/reconstructor heads ----
    sel = jnp.dot(cslab_ref[pl.ds(off_sel, selp), :], x, preferred_element_type=jnp.float32)
    y_ref[...] = (jnp.dot(sel, hslab_ref[pl.ds(0, D), :], preferred_element_type=jnp.float32)
                  + hslab_ref[pl.ds(D, 1), :])


# ----------------- parameter init (deterministic, synthetic, pre-packed) -----------------
def init_params(key):
    D = EMBED_DIM
    FC = FRAMES_PER_PATCH * IN_CHANNELS
    NCF = NUM_CLASSES + FC
    ks = iter(jax.random.split(key, 64))

    def nrm(shape, scale=0.02):
        return scale * jax.random.normal(next(ks), shape, dtype=jnp.float32)

    cls = jax.random.normal(next(ks), (1, D), dtype=jnp.float32)      # cls_embedding.normal_()
    in_w = nrm((FC, D))                                               # stored (in, out): x @ W
    in_b = nrm((1, D))

    # param slab: [in_w ; per-layer (wq wk wv wo w1 w2 stacked on rows, then 16 bias/LN rows)]
    blocks = [in_w]
    for _ in range(NUM_LAYERS):
        wq, wk, wv, wo = nrm((D, D)), nrm((D, D)), nrm((D, D)), nrm((D, D))
        w1, w2 = nrm((D, D)), nrm((D, D))                             # dim_feedforward == embedding_dim
        bq, bk, bv, bo = nrm((D,)), nrm((D,)), nrm((D,)), nrm((D,))
        b1, b2 = nrm((D,)), nrm((D,))
        g1, be1 = jnp.ones((D,), jnp.float32), jnp.zeros((D,), jnp.float32)
        g2, be2 = jnp.ones((D,), jnp.float32), jnp.zeros((D,), jnp.float32)
        wrows = jnp.concatenate([wq, wk, wv, wo, w1, w2], axis=0)                    # (6D, D)
        brows = jnp.stack([bq, bk, bv, bo, b1, b2, g1, be1, g2, be2], axis=0)        # (10, D)
        brows = jnp.pad(brows, ((0, 6), (0, 0)))                                     # (16, D)
        blocks.append(jnp.concatenate([wrows, brows], axis=0))                       # (208, D)
    pslab = jnp.concatenate(blocks, axis=0)                                          # (FC + L*208, D)

    # fused classifier + reconstructor heads, padded to a dense 128-lane slab
    cls_w, cls_b = nrm((D, NUM_CLASSES)), nrm((NUM_CLASSES,))
    rec_w, rec_b = nrm((D, FC)), nrm((FC,))
    hslab = jnp.zeros((D + 8, 128), jnp.float32)
    hslab = hslab.at[:D, :NUM_CLASSES].set(cls_w)
    hslab = hslab.at[:D, NUM_CLASSES:NCF].set(rec_w)
    hslab = hslab.at[D, :NUM_CLASSES].set(cls_b)
    hslab = hslab.at[D, NUM_CLASSES:NCF].set(rec_b)

    return {"cls": cls, "in_b": in_b, "pslab": pslab, "hslab": hslab}


# ----------------- host-side glue -----------------
def generate_selection_mask(batch_size, max_patch_length, selection_rate, cluster_size, seed=0):
    """Deterministic numpy replica of generate_mask (torch.randperm is host-side RNG too)."""
    rng = np.random.default_rng(seed)
    num_masked = int(max_patch_length * selection_rate)
    pad = cluster_size - 1
    pad_left = pad // 2
    pad_right = pad - pad_left
    mask = np.zeros((batch_size, max_patch_length), dtype=bool)
    for b in range(batch_size):
        sel = rng.permutation(max_patch_length)[:num_masked]
        for i in sel:   # fold/crop expansion == mark [i - pad_left, i + pad_right]
            mask[b, max(0, i - pad_left):min(max_patch_length, i + pad_right + 1)] = True
    return mask


def sinusoidal_pe(length, dim):
    # TODO(synk): AbsolutePositionalEncoding source not provided; standard sinusoidal assumed.
    pos = np.arange(length)[:, None].astype(np.float64)
    i = np.arange(0, dim, 2).astype(np.float64)
    div = np.exp(-np.log(10000.0) * i / dim)
    pe = np.zeros((length, dim), dtype=np.float32)
    pe[:, 0::2] = np.sin(pos * div)
    pe[:, 1::2] = np.cos(pos * div)
    return jnp.asarray(pe)


# ----------------- full forward -----------------
def model_forward(audio, params, selection_mask_np):
    Bn, C, Ln = audio.shape
    F_ = FRAMES_PER_PATCH
    padding = Ln % F_
    P = (Ln - padding) // F_
    FC = F_ * C
    D = EMBED_DIM
    H = NHEAD
    NCF = NUM_CLASSES + FC
    R = Bn * P + Bn                 # real rows: B*P patch rows, then B cls rows
    R_pad = D                       # pad sequence rows so every slab has width D, 8-aligned offsets
    assert R <= R_pad and R_pad % 8 == 0

    # patchify (== F.unfold + permute): target[b, p, f*C + c] = audio[b, c, p*F + f]
    xa = audio[:, :, :P * F_].reshape(Bn, C, P, F_)
    target2 = jnp.transpose(xa, (0, 2, 3, 1)).reshape(Bn * P, FC)
    data = jnp.concatenate([target2, jnp.zeros((R_pad - Bn * P, FC), jnp.float32)], axis=0)

    # keep mask (1 - selection_mask) broadcast over D; zero for cls/pad rows (their data rows are 0)
    keep_np = (1.0 - selection_mask_np.astype(np.float32)).reshape(Bn * P, 1)
    keepb = np.zeros((R_pad, D), np.float32)
    keepb[:Bn * P, :] = keep_np

    # additive row constant: keep*in_b + PE for patch rows, cls embedding for cls rows, 0 for pad
    pe = jnp.tile(sinusoidal_pe(P, D), (Bn, 1))                              # (B*P, D)
    addc = jnp.zeros((R_pad, D), jnp.float32)
    addc = addc.at[:Bn * P].set(jnp.asarray(keep_np) * params["in_b"] + pe)
    addc = addc.at[Bn * P:Bn * P + Bn].set(jnp.broadcast_to(params["cls"], (Bn, D)))

    # per-head lane mask for the row-folded attention
    hd = D // H
    hmask = np.zeros((H * R_pad, D), np.float32)
    for h in range(H):
        hmask[h * R_pad:(h + 1) * R_pad, h * hd:(h + 1) * hd] = 1.0

    # additive attention bias: attend iff same batch and both rows real; cls row b sits at B*P + b
    batch_of = np.full((R_pad,), -1, np.int64)
    batch_of[:Bn * P] = np.arange(Bn * P) // P
    batch_of[Bn * P:Bn * P + Bn] = np.arange(Bn)
    same = (batch_of[:, None] == batch_of[None, :]) & (batch_of[:, None] >= 0)
    bias = np.where(same, 0.0, -1e9).astype(np.float32)                      # (R_pad, R_pad)
    bias_hm = np.tile(bias, (H, 1))                                          # (H*R_pad, R_pad)

    # masked_select + pad_sequence realized as a static one-hot gather (mask is host-known)
    counts = selection_mask_np.sum(axis=-1).astype(np.int32)
    max_n = int(counts.max())
    SELP = int(-(-(Bn * max_n) // 8) * 8)
    sel_seq = np.zeros((SELP, R_pad), np.float32)
    for b in range(Bn):
        ids = np.nonzero(selection_mask_np[b])[0]
        for j, idx in enumerate(ids):
            sel_seq[b * max_n + j, b * P + idx] = 1.0

    cslab = jnp.concatenate([jnp.asarray(keepb), addc, jnp.asarray(hmask),
                             jnp.asarray(bias_hm), jnp.asarray(sel_seq)], axis=0)

    kernel = functools.partial(_fused_forward_kernel, nhead=H, num_layers=NUM_LAYERS,
                               rpad=R_pad, selp=SELP, d=D)

    def spec(shape):
        return pl.BlockSpec(shape, lambda i: (0,) * len(shape))

    y = pl.pallas_call(
        kernel,
        out_shape=jax.ShapeDtypeStruct((SELP, 128), jnp.float32),
        grid=(1,),
        in_specs=[spec(tuple(data.shape)), spec(tuple(cslab.shape)),
                  spec(tuple(params["pslab"].shape)), spec(tuple(params["hslab"].shape))],
        out_specs=spec((SELP, 128)),
        compiler_params=pltpu.CompilerParams(dimension_semantics=("arbitrary",)),
    )(data, cslab, params["pslab"], params["hslab"])

    classified = y[:Bn * max_n, :NUM_CLASSES].reshape(Bn, max_n, NUM_CLASSES)
    reconstructed = y[:Bn * max_n, NUM_CLASSES:NCF].reshape(Bn, max_n, FC)

    # selected target depends only on the host-known mask and the raw patches -> wrapper side
    sel_target = (jnp.asarray(sel_seq[:Bn * max_n, :Bn * P]) @ target2).reshape(Bn, max_n, FC)
    length = jnp.asarray(counts)
    return (classified, reconstructed), sel_target, length


if __name__ == "__main__":
    key = jax.random.PRNGKey(0)
    pkey, xkey = jax.random.split(key)
    params = init_params(pkey)
    audio = jax.random.normal(xkey, (B, IN_CHANNELS, L), dtype=jnp.float32)

    P = (L - L % FRAMES_PER_PATCH) // FRAMES_PER_PATCH
    sel_mask = generate_selection_mask(B, P, SELECTION_RATE, CLUSTER_SIZE, seed=0)

    (classified, reconstructed), target, length = model_forward(audio, params, sel_mask)
    jax.block_until_ready((classified, reconstructed, target, length))
    assert classified.shape[0] == B and classified.shape[-1] == NUM_CLASSES
    assert reconstructed.shape[-1] == FRAMES_PER_PATCH * IN_CHANNELS
    assert target.shape == reconstructed.shape and length.shape == (B,)
    print("KERNEL_OK")
</pallas_src>

<mosaic_0001>
module attributes {stable_mosaic.version = 11 : i64} {
  func.func @_fused_forward_kernel(%arg0: i32, %arg1: memref<32x16xf32, #tpu.memory_space<vmem>>, %arg2: memref<336x32xf32, #tpu.memory_space<vmem>>, %arg3: memref<432x32xf32, #tpu.memory_space<vmem>>, %arg4: memref<40x128xf32, #tpu.memory_space<vmem>>, %arg5: memref<16x128xf32, #tpu.memory_space<vmem>>) attributes {dimension_semantics = [#tpu.dimension_semantics<arbitrary>], iteration_bounds = array<i64: 1>, scalar_prefetch = 0 : i64, scratch_operands = 0 : i64, tpu.core_type = #tpu.core_type<tc>, window_params = [{pipeline_mode = #tpu.pipeline_mode<synchronous>, transform_indices = @transform_0, window_bounds = array<i64: 32, 16>}, {pipeline_mode = #tpu.pipeline_mode<synchronous>, transform_indices = @transform_1, window_bounds = array<i64: 336, 32>}, {pipeline_mode = #tpu.pipeline_mode<synchronous>, transform_indices = @transform_2, window_bounds = array<i64: 432, 32>}, {pipeline_mode = #tpu.pipeline_mode<synchronous>, transform_indices = @transform_3, window_bounds = array<i64: 40, 128>}, {pipeline_mode = #tpu.pipeline_mode<synchronous>, transform_indices = @transform_4, window_bounds = array<i64: 16, 128>}]} {
    %c0 = arith.constant 0 : index
    %c0_0 = arith.constant 0 : index
    %0 = vector.load %arg3[%c0, %c0_0] : memref<432x32xf32, #tpu.memory_space<vmem>>, vector<16x32xf32>
    %c0_1 = arith.constant 0 : index
    %c0_2 = arith.constant 0 : index
    %1 = vector.load %arg1[%c0_1, %c0_2] : memref<32x16xf32, #tpu.memory_space<vmem>>, vector<32x16xf32>
    %cst = arith.constant dense<0.000000e+00> : vector<32x32xf32>
    %2 = tpu.matmul %1, %0, %cst {dimension_numbers = #tpu.dot_dimension_numbers<[1], [0], [0], [1], [0, 0, 1, 1], [], []>} : vector<32x16xf32>, vector<16x32xf32>, vector<32x32xf32> -> vector<32x32xf32>
    %c0_3 = arith.constant 0 : index
    %c0_4 = arith.constant 0 : index
    %3 = vector.load %arg2[%c0_3, %c0_4] : memref<336x32xf32, #tpu.memory_space<vmem>>, vector<32x32xf32>
    %4 = arith.mulf %2, %3 : vector<32x32xf32>
    %c32 = arith.constant 32 : index
    %c0_5 = arith.constant 0 : index
    %5 = vector.load %arg2[%c32, %c0_5] : memref<336x32xf32, #tpu.memory_space<vmem>>, vector<32x32xf32>
    %6 = arith.addf %4, %5 : vector<32x32xf32>
    %c16 = arith.constant 16 : index
    %c0_6 = arith.constant 0 : index
    %7 = vector.load %arg3[%c16, %c0_6] : memref<432x32xf32, #tpu.memory_space<vmem>>, vector<32x32xf32>
    %c48 = arith.constant 48 : index
    %c0_7 = arith.constant 0 : index
    %8 = vector.load %arg3[%c48, %c0_7] : memref<432x32xf32, #tpu.memory_space<vmem>>, vector<32x32xf32>
    %c80 = arith.constant 80 : index
    %c0_8 = arith.constant 0 : index
    %9 = vector.load %arg3[%c80, %c0_8] : memref<432x32xf32, #tpu.memory_space<vmem>>, vector<32x32xf32>
    %c112 = arith.constant 112 : index
    %c0_9 = arith.constant 0 : index
    %10 = vector.load %arg3[%c112, %c0_9] : memref<432x32xf32, #tpu.memory_space<vmem>>, vector<32x32xf32>
    %c144 = arith.constant 144 : index
    %c0_10 = arith.constant 0 : index
    %11 = vector.load %arg3[%c144, %c0_10] : memref<432x32xf32, #tpu.memory_space<vmem>>, vector<32x32xf32>
    %c176 = arith.constant 176 : index
    %c0_11 = arith.constant 0 : index
    %12 = vector.load %arg3[%c176, %c0_11] : memref<432x32xf32, #tpu.memory_space<vmem>>, vector<32x32xf32>
    %c208 = arith.constant 208 : index
    %c0_12 = arith.constant 0 : index
    %13 = vector.load %arg3[%c208, %c0_12] : memref<432x32xf32, #tpu.memory_space<vmem>>, vector<1x32xf32>
    %c209 = arith.constant 209 : index
    %c0_13 = arith.constant 0 : index
    %14 = vector.load %arg3[%c209, %c0_13] : memref<432x32xf32, #tpu.memory_space<vmem>>, vector<1x32xf32>
    %c210 = arith.constant 210 : index
    %c0_14 = arith.constant 0 : index
    %15 = vector.load %arg3[%c210, %c0_14] : memref<432x32xf32, #tpu.memory_space<vmem>>, vector<1x32xf32>
    %c211 = arith.constant 211 : index
    %c0_15 = arith.constant 0 : index
    %16 = vector.load %arg3[%c211, %c0_15] : memref<432x32xf32, #tpu.memory_space<vmem>>, vector<1x32xf32>
    %c212 = arith.constant 212 : index
    %c0_16 = arith.constant 0 : index
    %17 = vector.load %arg3[%c212, %c0_16] : memref<432x32xf32, #tpu.memory_space<vmem>>, vector<1x32xf32>
    %c213 = arith.constant 213 : index
    %c0_17 = arith.constant 0 : index
    %18 = vector.load %arg3[%c213, %c0_17] : memref<432x32xf32, #tpu.memory_space<vmem>>, vector<1x32xf32>
    %c214 = arith.constant 214 : index
    %c0_18 = arith.constant 0 : index
    %19 = vector.load %arg3[%c214, %c0_18] : memref<432x32xf32, #tpu.memory_space<vmem>>, vector<1x32xf32>
    %c215 = arith.constant 215 : index
    %c0_19 = arith.constant 0 : index
    %20 = vector.load %arg3[%c215, %c0_19] : memref<432x32xf32, #tpu.memory_space<vmem>>, vector<1x32xf32>
    %c216 = arith.constant 216 : index
    %c0_20 = arith.constant 0 : index
    %21 = vector.load %arg3[%c216, %c0_20] : memref<432x32xf32, #tpu.memory_space<vmem>>, vector<1x32xf32>
    %c217 = arith.constant 217 : index
    %c0_21 = arith.constant 0 : index
    %22 = vector.load %arg3[%c217, %c0_21] : memref<432x32xf32, #tpu.memory_space<vmem>>, vector<1x32xf32>
    %cst_22 = arith.constant dense<0.000000e+00> : vector<32x32xf32>
    %23 = tpu.matmul %6, %7, %cst_22 {dimension_numbers = #tpu.dot_dimension_numbers<[1], [0], [0], [1], [0, 0, 1, 1], [], []>} : vector<32x32xf32>, vector<32x32xf32>, vector<32x32xf32> -> vector<32x32xf32>
    %24 = vector.broadcast %13 : vector<1x32xf32> to vector<32x32xf32>
    %25 = arith.addf %23, %24 : vector<32x32xf32>
    %cst_23 = arith.constant dense<0.000000e+00> : vector<32x32xf32>
    %26 = tpu.matmul %6, %8, %cst_23 {dimension_numbers = #tpu.dot_dimension_numbers<[1], [0], [0], [1], [0, 0, 1, 1], [], []>} : vector<32x32xf32>, vector<32x32xf32>, vector<32x32xf32> -> vector<32x32xf32>
    %27 = vector.broadcast %14 : vector<1x32xf32> to vector<32x32xf32>
    %28 = arith.addf %26, %27 : vector<32x32xf32>
    %cst_24 = arith.constant dense<0.000000e+00> : vector<32x32xf32>
    %29 = tpu.matmul %6, %9, %cst_24 {dimension_numbers = #tpu.dot_dimension_numbers<[1], [0], [0], [1], [0, 0, 1, 1], [], []>} : vector<32x32xf32>, vector<32x32xf32>, vector<32x32xf32> -> vector<32x32xf32>
    %30 = vector.broadcast %15 : vector<1x32xf32> to vector<32x32xf32>
    %31 = arith.addf %29, %30 : vector<32x32xf32>
    %c64 = arith.constant 64 : index
    %c0_25 = arith.constant 0 : index
    %32 = vector.load %arg2[%c64, %c0_25] : memref<336x32xf32, #tpu.memory_space<vmem>>, vector<128x32xf32>
    %33 = tpu.concatenate %25, %25, %25, %25 in 0 : vector<32x32xf32>, vector<32x32xf32>, vector<32x32xf32>, vector<32x32xf32> -> vector<128x32xf32>
    %34 = arith.mulf %33, %32 : vector<128x32xf32>
    %cst_26 = arith.constant dense<0.000000e+00> : vector<128x32xf32>
    %35 = tpu.matmul %34, %28, %cst_26 {dimension_numbers = #tpu.dot_dimension_numbers<[1], [1], [0], [0], [0, 0, 1, 0], [], []>} : vector<128x32xf32>, vector<32x32xf32>, vector<128x32xf32> -> vector<128x32xf32>
    %cst_27 = arith.constant 0.353553385 : f32
    %36 = vector.broadcast %cst_27 : f32 to vector<128x32xf32>
    %37 = arith.mulf %35, %36 : vector<128x32xf32>
    %c192 = arith.constant 192 : index
    %c0_28 = arith.constant 0 : index
    %38 = vector.load %arg2[%c192, %c0_28] : memref<336x32xf32, #tpu.memory_space<vmem>>, vector<128x32xf32>
    %39 = arith.addf %37, %38 : vector<128x32xf32>
    %cst_29 = arith.constant dense<0xFF800000> : vector<128xf32>
    %40 = vector.multi_reduction <maximumf>, %39, %cst_29 [1] : vector<128x32xf32> to vector<128xf32>
    %41 = vector.shape_cast %40 : vector<128xf32> to vector<128x1xf32>
    %42 = vector.broadcast %41 : vector<128x1xf32> to vector<128x32xf32>
    %43 = arith.subf %39, %42 : vector<128x32xf32>
    %44 = math.exp %43 : vector<128x32xf32>
    %cst_30 = arith.constant dense<0.000000e+00> : vector<128xf32>
    %45 = vector.multi_reduction <add>, %44, %cst_30 [1] : vector<128x32xf32> to vector<128xf32>
    %46 = vector.shape_cast %45 : vector<128xf32> to vector<128x1xf32>
    %47 = tpu.reciprocal %46 {approx = true} : vector<128x1xf32> -> vector<128x1xf32>
    %48 = vector.broadcast %47 : vector<128x1xf32> to vector<128x32xf32>
    %49 = arith.mulf %44, %48 : vector<128x32xf32>
    %cst_31 = arith.constant dense<0.000000e+00> : vector<128x32xf32>
    %50 = tpu.matmul %49, %31, %cst_31 {dimension_numbers = #tpu.dot_dimension_numbers<[1], [0], [0], [1], [0, 0, 1, 1], [], []>} : vector<128x32xf32>, vector<32x32xf32>, vector<128x32xf32> -> vector<128x32xf32>
    %51 = arith.mulf %50, %32 : vector<128x32xf32>
    %52 = vector.extract_strided_slice %51 {offsets = [0, 0], sizes = [32, 32], strides = [1, 1]} : vector<128x32xf32> to vector<32x32xf32>
    %53 = vector.extract_strided_slice %51 {offsets = [32, 0], sizes = [32, 32], strides = [1, 1]} : vector<128x32xf32> to vector<32x32xf32>
    %54 = arith.addf %52, %53 : vector<32x32xf32>
    %55 = vector.extract_strided_slice %51 {offsets = [64, 0], sizes = [32, 32], strides = [1, 1]} : vector<128x32xf32> to vector<32x32xf32>
    %56 = arith.addf %54, %55 : vector<32x32xf32>
    %57 = vector.extract_strided_slice %51 {offsets = [96, 0], sizes = [32, 32], strides = [1, 1]} : vector<128x32xf32> to vector<32x32xf32>
    %58 = arith.addf %56, %57 : vector<32x32xf32>
    %cst_32 = arith.constant dense<0.000000e+00> : vector<32x32xf32>
    %59 = tpu.matmul %58, %10, %cst_32 {dimension_numbers = #tpu.dot_dimension_numbers<[1], [0], [0], [1], [0, 0, 1, 1], [], []>} : vector<32x32xf32>, vector<32x32xf32>, vector<32x32xf32> -> vector<32x32xf32>
    %60 = vector.broadcast %16 : vector<1x32xf32> to vector<32x32xf32>
    %61 = arith.addf %59, %60 : vector<32x32xf32>
    %62 = arith.addf %6, %61 : vector<32x32xf32>
    %cst_33 = arith.constant dense<0.000000e+00> : vector<32xf32>
    %63 = vector.multi_reduction <add>, %62, %cst_33 [1] : vector<32x32xf32> to vector<32xf32>
    %64 = vector.shape_cast %63 : vector<32xf32> to vector<32x1xf32>
    %cst_34 = arith.constant 3.200000e+01 : f32
    %65 = vector.broadcast %cst_34 : f32 to vector<32x1xf32>
    %66 = arith.divf %64, %65 : vector<32x1xf32>
    %67 = vector.broadcast %66 : vector<32x1xf32> to vector<32x32xf32>
    %68 = arith.subf %62, %67 : vector<32x32xf32>
    %69 = arith.mulf %68, %68 : vector<32x32xf32>
    %cst_35 = arith.constant dense<0.000000e+00> : vector<32xf32>
    %70 = vector.multi_reduction <add>, %69, %cst_35 [1] : vector<32x32xf32> to vector<32xf32>
    %71 = vector.shape_cast %70 : vector<32xf32> to vector<32x1xf32>
    %cst_36 = arith.constant 3.200000e+01 : f32
    %72 = vector.broadcast %cst_36 : f32 to vector<32x1xf32>
    %73 = arith.divf %71, %72 : vector<32x1xf32>
    %74 = vector.broadcast %66 : vector<32x1xf32> to vector<32x32xf32>
    %75 = arith.subf %62, %74 : vector<32x32xf32>
    %cst_37 = arith.constant 9.99999974E-6 : f32
    %76 = vector.broadcast %cst_37 : f32 to vector<32x1xf32>
    %77 = arith.addf %73, %76 : vector<32x1xf32>
    %78 = math.rsqrt %77 : vector<32x1xf32>
    %79 = vector.broadcast %78 : vector<32x1xf32> to vector<32x32xf32>
    %80 = arith.mulf %75, %79 : vector<32x32xf32>
    %81 = vector.broadcast %19 : vector<1x32xf32> to vector<32x32xf32>
    %82 = arith.mulf %80, %81 : vector<32x32xf32>
    %83 = vector.broadcast %20 : vector<1x32xf32> to vector<32x32xf32>
    %84 = arith.addf %82, %83 : vector<32x32xf32>
    %cst_38 = arith.constant dense<0.000000e+00> : vector<32x32xf32>
    %85 = tpu.matmul %84, %11, %cst_38 {dimension_numbers = #tpu.dot_dimension_numbers<[1], [0], [0], [1], [0, 0, 1, 1], [], []>} : vector<32x32xf32>, vector<32x32xf32>, vector<32x32xf32> -> vector<32x32xf32>
    %86 = vector.broadcast %17 : vector<1x32xf32> to vector<32x32xf32>
    %87 = arith.addf %85, %86 : vector<32x32xf32>
    %cst_39 = arith.constant 0.000000e+00 : f32
    %88 = vector.broadcast %cst_39 : f32 to vector<32x32xf32>
    %89 = arith.maximumf %87, %88 : vector<32x32xf32>
    %cst_40 = arith.constant dense<0.000000e+00> : vector<32x32xf32>
    %90 = tpu.matmul %89, %12, %cst_40 {dimension_numbers = #tpu.dot_dimension_numbers<[1], [0], [0], [1], [0, 0, 1, 1], [], []>} : vector<32x32xf32>, vector<32x32xf32>, vector<32x32xf32> -> vector<32x32xf32>
    %91 = vector.broadcast %18 : vector<1x32xf32> to vector<32x32xf32>
    %92 = arith.addf %90, %91 : vector<32x32xf32>
    %93 = arith.addf %84, %92 : vector<32x32xf32>
    %cst_41 = arith.constant dense<0.000000e+00> : vector<32xf32>
    %94 = vector.multi_reduction <add>, %93, %cst_41 [1] : vector<32x32xf32> to vector<32xf32>
    %95 = vector.shape_cast %94 : vector<32xf32> to vector<32x1xf32>
    %cst_42 = arith.constant 3.200000e+01 : f32
    %96 = vector.broadcast %cst_42 : f32 to vector<32x1xf32>
    %97 = arith.divf %95, %96 : vector<32x1xf32>
    %98 = vector.broadcast %97 : vector<32x1xf32> to vector<32x32xf32>
    %99 = arith.subf %93, %98 : vector<32x32xf32>
    %100 = arith.mulf %99, %99 : vector<32x32xf32>
    %cst_43 = arith.constant dense<0.000000e+00> : vector<32xf32>
    %101 = vector.multi_reduction <add>, %100, %cst_43 [1] : vector<32x32xf32> to vector<32xf32>
    %102 = vector.shape_cast %101 : vector<32xf32> to vector<32x1xf32>
    %cst_44 = arith.constant 3.200000e+01 : f32
    %103 = vector.broadcast %cst_44 : f32 to vector<32x1xf32>
    %104 = arith.divf %102, %103 : vector<32x1xf32>
    %105 = vector.broadcast %97 : vector<32x1xf32> to vector<32x32xf32>
    %106 = arith.subf %93, %105 : vector<32x32xf32>
    %cst_45 = arith.constant 9.99999974E-6 : f32
    %107 = vector.broadcast %cst_45 : f32 to vector<32x1xf32>
    %108 = arith.addf %104, %107 : vector<32x1xf32>
    %109 = math.rsqrt %108 : vector<32x1xf32>
    %110 = vector.broadcast %109 : vector<32x1xf32> to vector<32x32xf32>
    %111 = arith.mulf %106, %110 : vector<32x32xf32>
    %112 = vector.broadcast %21 : vector<1x32xf32> to vector<32x32xf32>
    %113 = arith.mulf %111, %112 : vector<32x32xf32>
    %114 = vector.broadcast %22 : vector<1x32xf32> to vector<32x32xf32>
    %115 = arith.addf %113, %114 : vector<32x32xf32>
    %c224 = arith.constant 224 : index
    %c0_46 = arith.constant 0 : index
    %116 = vector.load %arg3[%c224, %c0_46] : memref<432x32xf32, #tpu.memory_space<vmem>>, vector<32x32xf32>
    %c256 = arith.constant 256 : index
    %c0_47 = arith.constant 0 : index
    %117 = vector.load %arg3[%c256, %c0_47] : memref<432x32xf32, #tpu.memory_space<vmem>>, vector<32x32xf32>
    %c288 = arith.constant 288 : index
    %c0_48 = arith.constant 0 : index
    %118 = vector.load %arg3[%c288, %c0_48] : memref<432x32xf32, #tpu.memory_space<vmem>>, vector<32x32xf32>
    %c320 = arith.constant 320 : index
    %c0_49 = arith.constant 0 : index
    %119 = vector.load %arg3[%c320, %c0_49] : memref<432x32xf32, #tpu.memory_space<vmem>>, vector<32x32xf32>
    %c352 = arith.constant 352 : index
    %c0_50 = arith.constant 0 : index
    %120 = vector.load %arg3[%c352, %c0_50] : memref<432x32xf32, #tpu.memory_space<vmem>>, vector<32x32xf32>
    %c384 = arith.constant 384 : index
    %c0_51 = arith.constant 0 : index
    %121 = vector.load %arg3[%c384, %c0_51] : memref<432x32xf32, #tpu.memory_space<vmem>>, vector<32x32xf32>
    %c416 = arith.constant 416 : index
    %c0_52 = arith.constant 0 : index
    %122 = vector.load %arg3[%c416, %c0_52] : memref<432x32xf32, #tpu.memory_space<vmem>>, vector<1x32xf32>
    %c417 = arith.constant 417 : index
    %c0_53 = arith.constant 0 : index
    %123 = vector.load %arg3[%c417, %c0_53] : memref<432x32xf32, #tpu.memory_space<vmem>>, vector<1x32xf32>
    %c418 = arith.constant 418 : index
    %c0_54 = arith.constant 0 : index
    %124 = vector.load %arg3[%c418, %c0_54] : memref<432x32xf32, #tpu.memory_space<vmem>>, vector<1x32xf32>
    %c419 = arith.constant 419 : index
    %c0_55 = arith.constant 0 : index
    %125 = vector.load %arg3[%c419, %c0_55] : memref<432x32xf32, #tpu.memory_space<vmem>>, vector<1x32xf32>
    %c420 = arith.constant 420 : index
    %c0_56 = arith.constant 0 : index
    %126 = vector.load %arg3[%c420, %c0_56] : memref<432x32xf32, #tpu.memory_space<vmem>>, vector<1x32xf32>
    %c421 = arith.constant 421 : index
    %c0_57 = arith.constant 0 : index
    %127 = vector.load %arg3[%c421, %c0_57] : memref<432x32xf32, #tpu.memory_space<vmem>>, vector<1x32xf32>
    %c422 = arith.constant 422 : index
    %c0_58 = arith.constant 0 : index
    %128 = vector.load %arg3[%c422, %c0_58] : memref<432x32xf32, #tpu.memory_space<vmem>>, vector<1x32xf32>
    %c423 = arith.constant 423 : index
    %c0_59 = arith.constant 0 : index
    %129 = vector.load %arg3[%c423, %c0_59] : memref<432x32xf32, #tpu.memory_space<vmem>>, vector<1x32xf32>
    %c424 = arith.constant 424 : index
    %c0_60 = arith.constant 0 : index
    %130 = vector.load %arg3[%c424, %c0_60] : memref<432x32xf32, #tpu.memory_space<vmem>>, vector<1x32xf32>
    %c425 = arith.constant 425 : index
    %c0_61 = arith.constant 0 : index
    %131 = vector.load %arg3[%c425, %c0_61] : memref<432x32xf32, #tpu.memory_space<vmem>>, vector<1x32xf32>
    %cst_62 = arith.constant dense<0.000000e+00> : vector<32x32xf32>
    %132 = tpu.matmul %115, %116, %cst_62 {dimension_numbers = #tpu.dot_dimension_numbers<[1], [0], [0], [1], [0, 0, 1, 1], [], []>} : vector<32x32xf32>, vector<32x32xf32>, vector<32x32xf32> -> vector<32x32xf32>
    %133 = vector.broadcast %122 : vector<1x32xf32> to vector<32x32xf32>
    %134 = arith.addf %132, %133 : vector<32x32xf32>
    %cst_63 = arith.constant dense<0.000000e+00> : vector<32x32xf32>
    %135 = tpu.matmul %115, %117, %cst_63 {dimension_numbers = #tpu.dot_dimension_numbers<[1], [0], [0], [1], [0, 0, 1, 1], [], []>} : vector<32x32xf32>, vector<32x32xf32>, vector<32x32xf32> -> vector<32x32xf32>
    %136 = vector.broadcast %123 : vector<1x32xf32> to vector<32x32xf32>
    %137 = arith.addf %135, %136 : vector<32x32xf32>
    %cst_64 = arith.constant dense<0.000000e+00> : vector<32x32xf32>
    %138 = tpu.matmul %115, %118, %cst_64 {dimension_numbers = #tpu.dot_dimension_numbers<[1], [0], [0], [1], [0, 0, 1, 1], [], []>} : vector<32x32xf32>, vector<32x32xf32>, vector<32x32xf32> -> vector<32x32xf32>
    %139 = vector.broadcast %124 : vector<1x32xf32> to vector<32x32xf32>
    %140 = arith.addf %138, %139 : vector<32x32xf32>
    %c64_65 = arith.constant 64 : index
    %c0_66 = arith.constant 0 : index
    %141 = vector.load %arg2[%c64_65, %c0_66] : memref<336x32xf32, #tpu.memory_space<vmem>>, vector<128x32xf32>
    %142 = tpu.concatenate %134, %134, %134, %134 in 0 : vector<32x32xf32>, vector<32x32xf32>, vector<32x32xf32>, vector<32x32xf32> -> vector<128x32xf32>
    %143 = arith.mulf %142, %141 : vector<128x32xf32>
    %cst_67 = arith.constant dense<0.000000e+00> : vector<128x32xf32>
    %144 = tpu.matmul %143, %137, %cst_67 {dimension_numbers = #tpu.dot_dimension_numbers<[1], [1], [0], [0], [0, 0, 1, 0], [], []>} : vector<128x32xf32>, vector<32x32xf32>, vector<128x32xf32> -> vector<128x32xf32>
    %cst_68 = arith.constant 0.353553385 : f32
    %145 = vector.broadcast %cst_68 : f32 to vector<128x32xf32>
    %146 = arith.mulf %144, %145 : vector<128x32xf32>
    %c192_69 = arith.constant 192 : index
    %c0_70 = arith.constant 0 : index
    %147 = vector.load %arg2[%c192_69, %c0_70] : memref<336x32xf32, #tpu.memory_space<vmem>>, vector<128x32xf32>
    %148 = arith.addf %146, %147 : vector<128x32xf32>
    %cst_71 = arith.constant dense<0xFF800000> : vector<128xf32>
    %149 = vector.multi_reduction <maximumf>, %148, %cst_71 [1] : vector<128x32xf32> to vector<128xf32>
    %150 = vector.shape_cast %149 : vector<128xf32> to vector<128x1xf32>
    %151 = vector.broadcast %150 : vector<128x1xf32> to vector<128x32xf32>
    %152 = arith.subf %148, %151 : vector<128x32xf32>
    %153 = math.exp %152 : vector<128x32xf32>
    %cst_72 = arith.constant dense<0.000000e+00> : vector<128xf32>
    %154 = vector.multi_reduction <add>, %153, %cst_72 [1] : vector<128x32xf32> to vector<128xf32>
    %155 = vector.shape_cast %154 : vector<128xf32> to vector<128x1xf32>
    %156 = tpu.reciprocal %155 {approx = true} : vector<128x1xf32> -> vector<128x1xf32>
    %157 = vector.broadcast %156 : vector<128x1xf32> to vector<128x32xf32>
    %158 = arith.mulf %153, %157 : vector<128x32xf32>
    %cst_73 = arith.constant dense<0.000000e+00> : vector<128x32xf32>
    %159 = tpu.matmul %158, %140, %cst_73 {dimension_numbers = #tpu.dot_dimension_numbers<[1], [0], [0], [1], [0, 0, 1, 1], [], []>} : vector<128x32xf32>, vector<32x32xf32>, vector<128x32xf32> -> vector<128x32xf32>
    %160 = arith.mulf %159, %141 : vector<128x32xf32>
    %161 = vector.extract_strided_slice %160 {offsets = [0, 0], sizes = [32, 32], strides = [1, 1]} : vector<128x32xf32> to vector<32x32xf32>
    %162 = vector.extract_strided_slice %160 {offsets = [32, 0], sizes = [32, 32], strides = [1, 1]} : vector<128x32xf32> to vector<32x32xf32>
    %163 = arith.addf %161, %162 : vector<32x32xf32>
    %164 = vector.extract_strided_slice %160 {offsets = [64, 0], sizes = [32, 32], strides = [1, 1]} : vector<128x32xf32> to vector<32x32xf32>
    %165 = arith.addf %163, %164 : vector<32x32xf32>
    %166 = vector.extract_strided_slice %160 {offsets = [96, 0], sizes = [32, 32], strides = [1, 1]} : vector<128x32xf32> to vector<32x32xf32>
    %167 = arith.addf %165, %166 : vector<32x32xf32>
    %cst_74 = arith.constant dense<0.000000e+00> : vector<32x32xf32>
    %168 = tpu.matmul %167, %119, %cst_74 {dimension_numbers = #tpu.dot_dimension_numbers<[1], [0], [0], [1], [0, 0, 1, 1], [], []>} : vector<32x32xf32>, vector<32x32xf32>, vector<32x32xf32> -> vector<32x32xf32>
    %169 = vector.broadcast %125 : vector<1x32xf32> to vector<32x32xf32>
    %170 = arith.addf %168, %169 : vector<32x32xf32>
    %171 = arith.addf %115, %170 : vector<32x32xf32>
    %cst_75 = arith.constant dense<0.000000e+00> : vector<32xf32>
    %172 = vector.multi_reduction <add>, %171, %cst_75 [1] : vector<32x32xf32> to vector<32xf32>
    %173 = vector.shape_cast %172 : vector<32xf32> to vector<32x1xf32>
    %cst_76 = arith.constant 3.200000e+01 : f32
    %174 = vector.broadcast %cst_76 : f32 to vector<32x1xf32>
    %175 = arith.divf %173, %174 : vector<32x1xf32>
    %176 = vector.broadcast %175 : vector<32x1xf32> to vector<32x32xf32>
    %177 = arith.subf %171, %176 : vector<32x32xf32>
    %178 = arith.mulf %177, %177 : vector<32x32xf32>
    %cst_77 = arith.constant dense<0.000000e+00> : vector<32xf32>
    %179 = vector.multi_reduction <add>, %178, %cst_77 [1] : vector<32x32xf32> to vector<32xf32>
    %180 = vector.shape_cast %179 : vector<32xf32> to vector<32x1xf32>
    %cst_78 = arith.constant 3.200000e+01 : f32
    %181 = vector.broadcast %cst_78 : f32 to vector<32x1xf32>
    %182 = arith.divf %180, %181 : vector<32x1xf32>
    %183 = vector.broadcast %175 : vector<32x1xf32> to vector<32x32xf32>
    %184 = arith.subf %171, %183 : vector<32x32xf32>
    %cst_79 = arith.constant 9.99999974E-6 : f32
    %185 = vector.broadcast %cst_79 : f32 to vector<32x1xf32>
    %186 = arith.addf %182, %185 : vector<32x1xf32>
    %187 = math.rsqrt %186 : vector<32x1xf32>
    %188 = vector.broadcast %187 : vector<32x1xf32> to vector<32x32xf32>
    %189 = arith.mulf %184, %188 : vector<32x32xf32>
    %190 = vector.broadcast %128 : vector<1x32xf32> to vector<32x32xf32>
    %191 = arith.mulf %189, %190 : vector<32x32xf32>
    %192 = vector.broadcast %129 : vector<1x32xf32> to vector<32x32xf32>
    %193 = arith.addf %191, %192 : vector<32x32xf32>
    %cst_80 = arith.constant dense<0.000000e+00> : vector<32x32xf32>
    %194 = tpu.matmul %193, %120, %cst_80 {dimension_numbers = #tpu.dot_dimension_numbers<[1], [0], [0], [1], [0, 0, 1, 1], [], []>} : vector<32x32xf32>, vector<32x32xf32>, vector<32x32xf32> -> vector<32x32xf32>
    %195 = vector.broadcast %126 : vector<1x32xf32> to vector<32x32xf32>
    %196 = arith.addf %194, %195 : vector<32x32xf32>
    %cst_81 = arith.constant 0.000000e+00 : f32
    %197 = vector.broadcast %cst_81 : f32 to vector<32x32xf32>
    %198 = arith.maximumf %196, %197 : vector<32x32xf32>
    %cst_82 = arith.constant dense<0.000000e+00> : vector<32x32xf32>
    %199 = tpu.matmul %198, %121, %cst_82 {dimension_numbers = #tpu.dot_dimension_numbers<[1], [0], [0], [1], [0, 0, 1, 1], [], []>} : vector<32x32xf32>, vector<32x32xf32>, vector<32x32xf32> -> vector<32x32xf32>
    %200 = vector.broadcast %127 : vector<1x32xf32> to vector<32x32xf32>
    %201 = arith.addf %199, %200 : vector<32x32xf32>
    %202 = arith.addf %193, %201 : vector<32x32xf32>
    %cst_83 = arith.constant dense<0.000000e+00> : vector<32xf32>
    %203 = vector.multi_reduction <add>, %202, %cst_83 [1] : vector<32x32xf32> to vector<32xf32>
    %204 = vector.shape_cast %203 : vector<32xf32> to vector<32x1xf32>
    %cst_84 = arith.constant 3.200000e+01 : f32
    %205 = vector.broadcast %cst_84 : f32 to vector<32x1xf32>
    %206 = arith.divf %204, %205 : vector<32x1xf32>
    %207 = vector.broadcast %206 : vector<32x1xf32> to vector<32x32xf32>
    %208 = arith.subf %202, %207 : vector<32x32xf32>
    %209 = arith.mulf %208, %208 : vector<32x32xf32>
    %cst_85 = arith.constant dense<0.000000e+00> : vector<32xf32>
    %210 = vector.multi_reduction <add>, %209, %cst_85 [1] : vector<32x32xf32> to vector<32xf32>
    %211 = vector.shape_cast %210 : vector<32xf32> to vector<32x1xf32>
    %cst_86 = arith.constant 3.200000e+01 : f32
    %212 = vector.broadcast %cst_86 : f32 to vector<32x1xf32>
    %213 = arith.divf %211, %212 : vector<32x1xf32>
    %214 = vector.broadcast %206 : vector<32x1xf32> to vector<32x32xf32>
    %215 = arith.subf %202, %214 : vector<32x32xf32>
    %cst_87 = arith.constant 9.99999974E-6 : f32
    %216 = vector.broadcast %cst_87 : f32 to vector<32x1xf32>
    %217 = arith.addf %213, %216 : vector<32x1xf32>
    %218 = math.rsqrt %217 : vector<32x1xf32>
    %219 = vector.broadcast %218 : vector<32x1xf32> to vector<32x32xf32>
    %220 = arith.mulf %215, %219 : vector<32x32xf32>
    %221 = vector.broadcast %130 : vector<1x32xf32> to vector<32x32xf32>
    %222 = arith.mulf %220, %221 : vector<32x32xf32>
    %223 = vector.broadcast %131 : vector<1x32xf32> to vector<32x32xf32>
    %224 = arith.addf %222, %223 : vector<32x32xf32>
    %c320_88 = arith.constant 320 : index
    %c0_89 = arith.constant 0 : index
    %225 = vector.load %arg2[%c320_88, %c0_89] : memref<336x32xf32, #tpu.memory_space<vmem>>, vector<16x32xf32>
    %cst_90 = arith.constant dense<0.000000e+00> : vector<16x32xf32>
    %226 = tpu.matmul %225, %224, %cst_90 {dimension_numbers = #tpu.dot_dimension_numbers<[1], [0], [0], [1], [0, 0, 1, 1], [], []>} : vector<16x32xf32>, vector<32x32xf32>, vector<16x32xf32> -> vector<16x32xf32>
    %c0_91 = arith.constant 0 : index
    %c0_92 = arith.constant 0 : index
    %227 = vector.load %arg4[%c0_91, %c0_92] : memref<40x128xf32, #tpu.memory_space<vmem>>, vector<32x128xf32>
    %cst_93 = arith.constant dense<0.000000e+00> : vector<16x128xf32>
    %228 = tpu.matmul %226, %227, %cst_93 {dimension_numbers = #tpu.dot_dimension_numbers<[1], [0], [0], [1], [0, 0, 1, 1], [], []>} : vector<16x32xf32>, vector<32x128xf32>, vector<16x128xf32> -> vector<16x128xf32>
    %c32_94 = arith.constant 32 : index
    %c0_95 = arith.constant 0 : index
    %229 = vector.load %arg4[%c32_94, %c0_95] : memref<40x128xf32, #tpu.memory_space<vmem>>, vector<1x128xf32>
    %230 = vector.broadcast %229 : vector<1x128xf32> to vector<16x128xf32>
    %231 = arith.addf %228, %230 : vector<16x128xf32>
    %c0_96 = arith.constant 0 : index
    %c0_97 = arith.constant 0 : index
    %232 = vector.load %arg5[%c0_96, %c0_97] : memref<16x128xf32, #tpu.memory_space<vmem>>, vector<16x128xf32>
    tpu.vector_store %arg5[%c0_96, %c0_97], %231 {strides = array<i32>} : memref<16x128xf32, #tpu.memory_space<vmem>>, vector<16x128xf32>,
    return
  }
  func.func @transform_0(%arg0: i32) -> (i32, i32) {
    %c0_i32 = arith.constant 0 : i32
    %c0_i32_0 = arith.constant 0 : i32
    %c0_i32_1 = arith.constant 0 : i32
    return %c0_i32, %c0_i32_0 : i32, i32
  }
  func.func @transform_1(%arg0: i32) -> (i32, i32) {
    %c0_i32 = arith.constant 0 : i32
    %c0_i32_0 = arith.constant 0 : i32
    %c0_i32_1 = arith.constant 0 : i32
    return %c0_i32, %c0_i32_0 : i32, i32
  }
  func.func @transform_2(%arg0: i32) -> (i32, i32) {
    %c0_i32 = arith.constant 0 : i32
    %c0_i32_0 = arith.constant 0 : i32
    %c0_i32_1 = arith.constant 0 : i32
    return %c0_i32, %c0_i32_0 : i32, i32
  }
  func.func @transform_3(%arg0: i32) -> (i32, i32) {
    %c0_i32 = arith.constant 0 : i32
    %c0_i32_0 = arith.constant 0 : i32
    %c0_i32_1 = arith.constant 0 : i32
    return %c0_i32, %c0_i32_0 : i32, i32
  }
  func.func @transform_4(%arg0: i32) -> (i32, i32) {
    %c0_i32 = arith.constant 0 : i32
    %c0_i32_0 = arith.constant 0 : i32
    %c0_i32_1 = arith.constant 0 : i32
    return %c0_i32, %c0_i32_0 : i32, i32
  }
}

</mosaic_0001>

<bundles_post_ra>
// kernel: tpu_custom_call.1
= control target key start
LH: loop header
LB: loop body
LE: loop exit
PB: predicated region body
PF: predicated region fallthrough
CT: control target
= control target key end

     0   :  { %vm24_vm0 = vcmask 130048   ;;  %s5438_s0 = inlined_call_operand.vmem [shape: f32[32,16], index: 0, kind: input, shape index: {}]   ;;  %s5439_s1 = inlined_call_operand.vmem [shape: f32[336,32], index: 1, kind: input, shape index: {}]   ;;  %s5440_s2 = inlined_call_operand.vmem [shape: f32[432,32], index: 2, kind: input, shape index: {}]   ;;  %s5441_s3 = inlined_call_operand.vmem [shape: f32[40,128], index: 3, kind: input, shape index: {}]   ;;  %s5442_s4 = inlined_call_operand.hbm [shape: f32[16,128], index: 4, kind: output, shape index: {}]  }
   0x1   :  { %v18_v0 = vld [vmem:[%s5440_s2] sm:$0xff]  ;;  %v19_v1 = vld [vmem:[%s5440_s2 + $0x8] sm:$0xff]  ;;  %v138_v4 = vld [vmem:[%s5440_s2 + $0x10] sm:$0xff] }
   0x2   :  { %v20_v2 = vld [vmem:[%s5438_s0] sm:$0xff]  ;;  %v3862_v3 = vpack.c.bf16 %v19_v1, %v18_v0  ;;  %v139_v5 = vld [vmem:[%s5440_s2 + $0x18] sm:$0xff]  ;;  %v142_v6 = vld [vmem:[%s5440_s2 + $0x30] sm:$0xff] }
   0x3   :  { %3538 = vmatprep.mubr.msk.f32.mxu0 %vm24_vm0, %v20_v2  ;;  %v3866_v7 = vpack.c.bf16 %v139_v5, %v138_v4  ;;  %v143_v8 = vld [vmem:[%s5440_s2 + $0x38] sm:$0xff] }
   0x4   :  { %3863 = vmatprep.subr.bf16.mxu0 %v3862_v3 }
   0x5   :  { %9 = vsyncpa [#allocation3], 0  ;;  %3865 = vmatpush3.bf16.msra.mxu0 %v3862_v3  ;;  %v21_v9 = vld [vmem:[%s5438_s0 + $0x8] sm:$0xff]  ;;  %v3874_v10 = vpack.c.bf16 %v143_v8, %v142_v6  ;;  %v22_v11 = vld [vmem:[%s5438_s0 + $0x10] sm:$0xff]  ;;  %3867 = vmatprep.subr.bf16.mxu1 %v3866_v7  ;;  %vm176_vm1 = vcmask 261120   ;;  %s4237_s23 = smov [#allocation2]  }
   0x6   :  { %3869 = vmatpush3.bf16.msra.mxu1 %v3866_v7  ;;  %v23_v12 = vld [vmem:[%s5438_s0 + $0x18] sm:$0xff]  ;;  %v140_v13 = vld [vmem:[%s5440_s2 + $0x20] sm:$0xff]  ;;  %v141_v14 = vld [vmem:[%s5440_s2 + $0x28] sm:$0xff]  ;;  %s3180_s24 = sshll.u32 %s4237_s23, 4  ;;  %s3181_s24 = int_to_ptr.vmem [resolvable:$true] %s3180_s24 }
   0x7   :  { %3875 = vmatprep.subr.bf16.mxu0 %v3874_v10  ;;  %v3870_v15 = vpack.c.bf16 %v141_v14, %v140_v13  ;;  %v144_v16 = vld [vmem:[%s5440_s2 + $0x40] sm:$0xff]  ;;  %v145_v17 = vld [vmem:[%s5440_s2 + $0x48] sm:$0xff]  ;;  %v146_v19 = vld [vmem:[%s5440_s2 + $0x50] sm:$0xff]  ;;  %p4218_p1 = scmp.lt.s32.totalorder %s3181_s24, %s3181_s24 }
   0x8   :  { %3539 = vmatmul.mubr.msk.f32.vlgmr.msra.gmra.mrb[0].mxu0 %vm24_vm0, %v21_v9  ;;  %v3878_v18 = vpack.c.bf16 %v145_v17, %v144_v16  ;;  %v147_v20 = vld [vmem:[%s5440_s2 + $0x58] sm:$0xff]  ;;  %v123_v22 = vld [vmem:[%s5439_s1 + $0x8] sm:$0xff]  ;;  %v122_v23 = vld [vmem:[%s5439_s1] sm:$0xff] }
   0x9   :  { %3541 = vmatprep.mubr.msk.f32.mxu0 %vm24_vm0, %v22_v11  ;;  %3877 = vmatpush3.bf16.msra.mxu0 %v3874_v10  ;;  %v3882_v21 = vpack.c.bf16 %v147_v20, %v146_v19  ;;  %v131_v26 = vld [vmem:[%s5439_s1 + $0x28] sm:$0xff]  ;;  %v130_v28 = vld [vmem:[%s5439_s1 + $0x20] sm:$0xff]  ;;  %v125_v30 = vld [vmem:[%s5439_s1 + $0x18] sm:$0xff] }
   0xa   :  { %3871 = vmatprep.subr.bf16.mxu1 %v3870_v15  ;;  %3879 = vmatprep.subr.bf16.mxu0 %v3878_v18  ;;  %v148_v31 = vld [vmem:[%s5440_s2 + $0x60] sm:$0xff]  ;;  %v149_v32 = vld [vmem:[%s5440_s2 + $0x68] sm:$0xff]  ;;  %v124_v33 = vld [vmem:[%s5439_s1 + $0x10] sm:$0xff] }
   0xb   :  { %3873 = vmatpush3.bf16.msra.mxu1 %v3870_v15  ;;  %v133_v36 = vld [vmem:[%s5439_s1 + $0x38] sm:$0xff]  ;;  %v132_v40 = vld [vmem:[%s5439_s1 + $0x30] sm:$0xff]  ;;  %v3886_v41 = vpack.c.bf16 %v149_v32, %v148_v31  ;;  %v4388_v52 = vld [vmem:[%s5439_s1 + $0x40] sm:$0xff] }
   0xc   :  { %3542 = vmatmul.mubr.msk.f32.gmra.mrb[2].mxu0 %vm24_vm0, %v23_v12  ;;  %3883 = vmatprep.subr.bf16.mxu1 %v3882_v21  ;;  %v3200_v45 = vld [vmem:[%s5440_s2 + $0xd1] ss:$0 sm:$0xff]  ;;  %v3195_v46 = vld [vmem:[%s5440_s2 + $0xd0] ss:$0 sm:$0xff]  ;;  %vm4394_vm2 = vmpackc.low %vm176_vm1, %vm176_vm1 }
   0xd   :  { %3881 = vmatpush3.bf16.msra.mxu0 %v3878_v18  ;;  %v3205_v0 = vld [vmem:[%s5440_s2 + $0xd2] ss:$0 sm:$0xff]  ;;  %v4415_v13 = vld [vmem:[%s5439_s1 + $0x48] sm:$0xff]  ;;  %v4427_v19 = vld [vmem:[%s5439_s1 + $0x58] sm:$0xff] }
   0xe   :  { %v4420_v15 = vld [vmem:[%s5439_s1 + $0x50] sm:$0xff]  ;;  %v4433_v20 = vld [vmem:[%s5439_s1 + $0x60] sm:$0xff]  ;;  %v4471_v31 = vld [vmem:[%s5439_s1 + $0x88] sm:$0xff] }
   0xf   :  { %v4477_v32 = vld [vmem:[%s5439_s1 + $0x90] sm:$0xff] }
  0xdb   :  { %v3540_v24 = vpop.f32.mrb[0].mxu0 }
  0xdc   :  { %v127_v25 = vmul.f32 %v3540_v24, %v123_v22  ;;  %v103_v27 = vpop.f32.mrb[1].mxu0  ;;  %v4448_v24 = vld [vmem:[%s5439_s1 + $0x70] sm:$0xff] }
  0xdd   :  { %v126_v29 = vmul.f32 %v122_v23, %v103_v27  ;;  %v4442_v23 = vld [vmem:[%s5439_s1 + $0x68] sm:$0xff]  ;;  %v4456_v27 = vld [vmem:[%s5439_s1 + $0x78] sm:$0xff] }
  0xde   :  { %v4346_v37 = vadd.f32 %v131_v26, %v127_v25 }
  0xdf   :  { %v4341_v34 = vadd.f32 %v130_v28, %v126_v29  ;;  %v3543_v35 = vpop.f32.mrb[2].mxu0  ;;  %v4462_v28 = vld [vmem:[%s5439_s1 + $0x80] sm:$0xff] }
  0xe0   :  { %v129_v38 = vmul.f32 %v3543_v35, %v125_v30  ;;  %v113_v39 = vpop.f32.mrb[3].mxu0 }
  0xe1   :  { %v128_v42 = vmul.f32 %v124_v33, %v113_v39  ;;  %3552 = vmatprep.mubr.msk.f32.mxu1 %vm176_vm1, %v4341_v34  ;;  %3566 = vmatprep.mubr.msk.f32.mxu0 %vm176_vm1, %v4341_v34 }
  0xe2   :  { %v4355_v43 = vadd.f32 %v133_v36, %v129_v38  ;;  %3553 = vmatmul.mubr.msk.f32.vlgmr.msra.gmra.mrb[0].mxu1 %vm176_vm1, %v4346_v37  ;;  %3567 = vmatmul.mubr.msk.f32.vlgmr.msra.gmra.mrb[4].mxu0 %vm176_vm1, %v4346_v37  ;;  %v4485_v36 = vld [vmem:[%s5439_s1 + $0x98] sm:$0xff]  ;;  %v4491_v38 = vld [vmem:[%s5439_s1 + $0xa0] sm:$0xff] }
  0xe3   :  { %v4361_v44 = vadd.f32 %v132_v40, %v128_v42  ;;  %3885 = vmatpush3.bf16.msra.mxu1 %v3882_v21  ;;  %v4506_v42 = vld [vmem:[%s5439_s1 + $0xb0] sm:$0xff] }
  0xe4   :  { %3887 = vmatprep.subr.bf16.mxu1 %v3886_v41 }
  0xe5   :  { %3555 = vmatprep.mubr.msk.f32.mxu1 %vm176_vm1, %v4361_v44  ;;  %3569 = vmatprep.mubr.msk.f32.mxu0 %vm176_vm1, %v4361_v44 }
  0xe6   :  { %3556 = vmatmul.mubr.msk.f32.gmra.mrb[2].mxu1 %vm176_vm1, %v4355_v43  ;;  %3570 = vmatmul.mubr.msk.f32.gmra.mrb[6].mxu0 %vm176_vm1, %v4355_v43 }
  0xe7   :  { %3889 = vmatpush3.bf16.msra.mxu1 %v3886_v41  ;;  %3580 = vmatprep.mubr.msk.f32.mxu1 %vm176_vm1, %v4341_v34  ;;  %v4500_v41 = vld [vmem:[%s5439_s1 + $0xa8] sm:$0xff] }
  0xea   :  { %3581 = vmatmul.mubr.msk.f32.vlgmr.msra.gmra.mrb[4].mxu1 %vm176_vm1, %v4346_v37 }
  0xeb   :  { %3583 = vmatprep.mubr.msk.f32.mxu1 %vm176_vm1, %v4361_v44 }
  0xee   :  { %3584 = vmatmul.mubr.msk.f32.gmra.mrb[6].mxu1 %vm176_vm1, %v4355_v43 }
 0x1b5   :  { %v3554_v47 = vpop.f32.mrb[0].mxu1  ;;  %v3568_v48 = vpop.f32.mrb[4].mxu0 }
 0x1b6   :  { %v350_v49 = vadd.f32 %v3568_v48, %v3200_v45  ;;  %v255_v50 = vpop.f32.mrb[1].mxu1  ;;  %v344_v51 = vpop.f32.mrb[5].mxu0  ;;  %v261_v11 = vadd.f32 %v3554_v47, %v3195_v46  ;;  %v4514_v47 = vld [vmem:[%s5439_s1 + $0xb8] sm:$0xff] }
 0x1b7   :  { %v4390_v53 = vadd.f32 %v3195_v46, %v255_v50  ;;  %v345_v54 = vadd.f32 %v3200_v45, %v344_v51  ;;  %v705_v51 = vld [vmem:[%s5439_s1 + $0xc0] sm:$0xff] }
 0x1b8   :  { %v469_v16 = vmul.f32 %v4415_v13, %v261_v11  ;;  %v473_v25 = vmul.f32 %v4442_v23, %v261_v11  ;;  %v477_v33 = vmul.f32 %v4471_v31, %v261_v11 }
 0x1b9   :  { %v3890_v56 = vpack.c.bf16 %v350_v49, %v345_v54  ;;  %v3557_v57 = vpop.f32.mrb[2].mxu1  ;;  %v3571_v58 = vpop.f32.mrb[6].mxu0  ;;  %v468_v59 = vmul.f32 %v4388_v52, %v4390_v53  ;;  %v472_v22 = vmul.f32 %v4433_v20, %v4390_v53  ;;  %v476_v30 = vmul.f32 %v4462_v28, %v4390_v53 }
 0x1ba   :  { %v360_v60 = vadd.f32 %v3571_v58, %v3200_v45  ;;  %v265_v61 = vpop.f32.mrb[3].mxu1  ;;  %v354_v62 = vpop.f32.mrb[7].mxu0  ;;  %v271_v17 = vadd.f32 %v3557_v57, %v3195_v46  ;;  %v480_v40 = vmul.f32 %v4491_v38, %v4390_v53 }
 0x1bb   :  { %v355_v63 = vadd.f32 %v3200_v45, %v354_v62  ;;  %3892 = vmatprep.subr.msk.bf16.mxu0 %vm4394_vm2, %v3890_v56  ;;  %3594 = vmatprep.mubr.msk.f32.mxu0 %vm176_vm1, %v468_v59  ;;  %v266_v14 = vadd.f32 %v3195_v46, %v265_v61  ;;  %v481_v45 = vmul.f32 %v4500_v41, %v261_v11  ;;  %v710_v11 = vld [vmem:[%s5439_s1 + $0xe8] sm:$0xff] }
 0x1bc   :  { %3895 = vmatpush3.bf16.xpose.msk.msra.mxu0 %vm4394_vm2, %v3890_v56  ;;  %v471_v21 = vmul.f32 %v4427_v19, %v271_v17  ;;  %v475_v29 = vmul.f32 %v4456_v27, %v271_v17  ;;  %v479_v39 = vmul.f32 %v4485_v36, %v271_v17  ;;  %v483_v48 = vmul.f32 %v4514_v47, %v271_v17  ;;  %v706_v56 = vld [vmem:[%s5439_s1 + $0xc8] sm:$0xff] }
 0x1bd   :  { %v3896_v1 = vpack.c.bf16 %v360_v60, %v355_v63  ;;  %v3582_v2 = vpop.f32.mrb[4].mxu1  ;;  %v470_v18 = vmul.f32 %v4420_v15, %v266_v14  ;;  %v474_v26 = vmul.f32 %v4448_v24, %v266_v14  ;;  %v478_v35 = vmul.f32 %v4477_v32, %v266_v14  ;;  %v707_v60 = vld [vmem:[%s5439_s1 + $0xd0] sm:$0xff] }
 0x1be   :  { %v439_v3 = vadd.f32 %v3582_v2, %v3205_v0  ;;  %v433_v4 = vpop.f32.mrb[5].mxu1  ;;  %v482_v46 = vmul.f32 %v4506_v42, %v266_v14 }
 0x1bf   :  { %v434_v5 = vadd.f32 %v3205_v0, %v433_v4  ;;  %3898 = vmatprep.subr.msk.bf16.mxu0 %vm4394_vm2, %v3896_v1 }
 0x1c1   :  { %v3902_v6 = vpack.c.bf16 %v439_v3, %v434_v5  ;;  %v3585_v7 = vpop.f32.mrb[6].mxu1 }
 0x1c2   :  { %v449_v8 = vadd.f32 %v3585_v7, %v3205_v0  ;;  %v443_v9 = vpop.f32.mrb[7].mxu1 }
 0x1c3   :  { %v444_v10 = vadd.f32 %v3205_v0, %v443_v9  ;;  %3903 = vmatprep.subr.bf16.mxu1 %v3902_v6 }
 0x1c4   :  { %3901 = vmatpush3.bf16.xpose.msk.msra.mxu0 %vm4394_vm2, %v3896_v1  ;;  %3905 = vmatpush3.bf16.msra.mxu1 %v3902_v6  ;;  %v708_v1 = vld [vmem:[%s5439_s1 + $0xd8] sm:$0xff]  ;;  %v709_v6 = vld [vmem:[%s5439_s1 + $0xe0] sm:$0xff] }
 0x1c5   :  { %v3906_v12 = vpack.c.bf16 %v449_v8, %v444_v10 }
 0x1c7   :  { %3907 = vmatprep.subr.bf16.mxu1 %v3906_v12 }
 0x1c8   :  { %3909 = vmatpush3.bf16.msra.mxu1 %v3906_v12 }
 0x1cb   :  { %3595 = vmatmul.mubr.msk.f32.vlgmr.msra.gmra.mrb[8].mxu0 %vm176_vm1, %v469_v16 }
 0x1cc   :  { %3597 = vmatprep.mubr.msk.f32.mxu0 %vm176_vm1, %v470_v18  ;;  %v711_v18 = vld [vmem:[%s5439_s1 + $0xf0] sm:$0xff] }
 0x1cf   :  { %3598 = vmatmul.mubr.msk.f32.gmra.mrb[10].mxu0 %vm176_vm1, %v471_v21 }
 0x1d0   :  { %3600 = vmatprep.mubr.msk.f32.mxu0 %vm176_vm1, %v472_v22 }
 0x1d3   :  { %3601 = vmatmul.mubr.msk.f32.gmra.mrb[12].mxu0 %vm176_vm1, %v473_v25 }
 0x1d4   :  { %3603 = vmatprep.mubr.msk.f32.mxu0 %vm176_vm1, %v474_v26 }
 0x1d7   :  { %3604 = vmatmul.mubr.msk.f32.gmra.mrb[14].mxu0 %vm176_vm1, %v475_v29  ;;  %v712_v29 = vld [vmem:[%s5439_s1 + $0xf8] sm:$0xff] }
 0x1d8   :  { %3606 = vmatprep.mubr.msk.f32.mxu0 %vm176_vm1, %v476_v30 }
 0x1db   :  { %3607 = vmatmul.mubr.msk.f32.gmra.mrb[16].mxu0 %vm176_vm1, %v477_v33 }
 0x1dc   :  { %3609 = vmatprep.mubr.msk.f32.mxu0 %vm176_vm1, %v478_v35 }
 0x1df   :  { %3610 = vmatmul.mubr.msk.f32.gmra.mrb[18].mxu0 %vm176_vm1, %v479_v39 }
 0x1e0   :  { %3612 = vmatprep.mubr.msk.f32.mxu0 %vm176_vm1, %v480_v40  ;;  %v713_v40 = vld [vmem:[%s5439_s1 + $0x100] sm:$0xff] }
 0x1e3   :  { %3613 = vmatmul.mubr.msk.f32.gmra.mrb[20].mxu0 %vm176_vm1, %v481_v45 }
 0x1e4   :  { %3615 = vmatprep.mubr.msk.f32.mxu0 %vm176_vm1, %v482_v46 }
 0x1e7   :  { %3616 = vmatmul.mubr.msk.f32.gmra.mrb[22].mxu0 %vm176_vm1, %v483_v48 }
 0x29e   :  { %v3596_v49 = vpop.f32.mrb[8].mxu0 }
 0x29f   :  { %v610_v50 = vpop.f32.mrb[9].mxu0  ;;  %v690_v53 = vmul.f32 0.35355338, %v3596_v49 }
 0x2a0   :  { %v689_v54 = vmul.f32 0.35355338, %v610_v50  ;;  %v714_v50 = vld [vmem:[%s5439_s1 + $0x108] sm:$0xff] }
 0x2a1   :  { %v4533_v0 = vadd.f32 %v706_v56, %v690_v53 }
 0x2a2   :  { %v3599_v57 = vpop.f32.mrb[10].mxu0  ;;  %v4526_v58 = vadd.f32 %v705_v51, %v689_v54 }
 0x2a3   :  { %v620_v59 = vpop.f32.mrb[11].mxu0  ;;  %v692_v61 = vmul.f32 0.35355338, %v3599_v57  ;;  %v740_v8 = vsel %vm176_vm1, %v4533_v0, -inf  ;;  %v715_v57 = vld [vmem:[%s5439_s1 + $0x110] sm:$0xff] }
 0x2a4   :  { %v691_v62 = vmul.f32 0.35355338, %v620_v59  ;;  %v737_v63 = vsel %vm176_vm1, %v4526_v58, -inf }
 0x2a5   :  { %738 = vmax.xlane.f32.xlu0 %v737_v63  ;;  %v4547_v10 = vadd.f32 %v708_v1, %v692_v61  ;;  %v716_v63 = vld [vmem:[%s5439_s1 + $0x118] sm:$0xff] }
 0x2a6   :  { %v3602_v2 = vpop.f32.mrb[12].mxu0  ;;  %v4538_v3 = vadd.f32 %v707_v60, %v691_v62 }
 0x2a7   :  { %v694_v4 = vmul.f32 0.35355338, %v3602_v2  ;;  %v630_v5 = vpop.f32.mrb[13].mxu0  ;;  %v746_v25 = vsel %vm176_vm1, %v4547_v10, -inf }
 0x2a8   :  { %v693_v7 = vmul.f32 0.35355338, %v630_v5  ;;  %v743_v9 = vsel %vm176_vm1, %v4538_v3, -inf }
 0x2a9   :  { %741 = vmax.xlane.f32.xlu0 %v740_v8  ;;  %744 = vmax.xlane.f32.xlu1 %v743_v9  ;;  %v4554_v17 = vadd.f32 %v710_v11, %v694_v4 }
 0x2aa   :  { %v3605_v12 = vpop.f32.mrb[14].mxu0  ;;  %v4552_v14 = vadd.f32 %v709_v6, %v693_v7  ;;  %v717_v6 = vld [vmem:[%s5439_s1 + $0x120] sm:$0xff] }
 0x2ab   :  { %v640_v16 = vpop.f32.mrb[15].mxu0  ;;  %v696_v21 = vmul.f32 0.35355338, %v3605_v12  ;;  %v752_v39 = vsel %vm176_vm1, %v4554_v17, -inf  ;;  %v718_v12 = vld [vmem:[%s5439_s1 + $0x128] sm:$0xff] }
 0x2ac   :  { %v695_v22 = vmul.f32 0.35355338, %v640_v16  ;;  %v749_v26 = vsel %vm176_vm1, %v4552_v14, -inf }
 0x2ad   :  { %747 = vmax.xlane.f32.xlu1 %v746_v25  ;;  %750 = vmax.xlane.f32.xlu0 %v749_v26  ;;  %v4575_v49 = vadd.f32 %v712_v29, %v696_v21  ;;  %v719_v25 = vld [vmem:[%s5439_s1 + $0x130] sm:$0xff] }
 0x2ae   :  { %v3608_v30 = vpop.f32.mrb[16].mxu0  ;;  %v4566_v33 = vadd.f32 %v711_v18, %v695_v22 }
 0x2af   :  { %v650_v35 = vpop.f32.mrb[17].mxu0  ;;  %v698_v45 = vmul.f32 0.35355338, %v3608_v30  ;;  %v758_v60 = vsel %vm176_vm1, %v4575_v49, -inf }
 0x2b0   :  { %v697_v46 = vmul.f32 0.35355338, %v650_v35  ;;  %v755_v48 = vsel %vm176_vm1, %v4566_v33, -inf }
 0x2b1   :  { %753 = vmax.xlane.f32.xlu1 %v752_v39  ;;  %756 = vmax.xlane.f32.xlu0 %v755_v48  ;;  %v4589_v62 = vadd.f32 %v714_v50, %v698_v45  ;;  %v720_v39 = vld [vmem:[%s5439_s1 + $0x138] sm:$0xff] }
 0x2b2   :  { %v3611_v51 = vpop.f32.mrb[18].mxu0  ;;  %v4580_v53 = vadd.f32 %v713_v40, %v697_v46 }
 0x2b3   :  { %v700_v54 = vmul.f32 0.35355338, %v3611_v51  ;;  %v660_v56 = vpop.f32.mrb[19].mxu0  ;;  %v764_v9 = vsel %vm176_vm1, %v4589_v62, -inf }
 0x2b4   :  { %v699_v59 = vmul.f32 0.35355338, %v660_v56  ;;  %v761_v61 = vsel %vm176_vm1, %v4580_v53, -inf }
 0x2b5   :  { %759 = vmax.xlane.f32.xlu1 %v758_v60  ;;  %762 = vmax.xlane.f32.xlu0 %v761_v61  ;;  %v4596_v5 = vadd.f32 %v716_v63, %v700_v54 }
 0x2b6   :  { %v3614_v1 = vpop.f32.mrb[20].mxu0  ;;  %v4594_v2 = vadd.f32 %v715_v57, %v699_v59 }
 0x2b7   :  { %v670_v4 = vpop.f32.mrb[21].mxu0  ;;  %v702_v7 = vmul.f32 0.35355338, %v3614_v1  ;;  %v770_v22 = vsel %vm176_vm1, %v4596_v5, -inf }
 0x2b8   :  { %v701_v8 = vmul.f32 0.35355338, %v670_v4  ;;  %v767_v11 = vsel %vm176_vm1, %v4594_v2, -inf }
 0x2b9   :  { %765 = vmax.xlane.f32.xlu1 %v764_v9  ;;  %768 = vmax.xlane.f32.xlu0 %v767_v11  ;;  %v4617_v35 = vadd.f32 %v718_v12, %v702_v7 }
 0x2ba   :  { %v3617_v16 = vpop.f32.mrb[22].mxu0  ;;  %v4608_v18 = vadd.f32 %v717_v6, %v701_v8 }
 0x2bb   :  { %v680_v21 = vpop.f32.mrb[23].mxu0  ;;  %v704_v26 = vmul.f32 0.35355338, %v3617_v16  ;;  %v776_v45 = vsel %vm176_vm1, %v4617_v35, -inf }
 0x2bc   :  { %v703_v29 = vmul.f32 0.35355338, %v680_v21  ;;  %v773_v30 = vsel %vm176_vm1, %v4608_v18, -inf }
 0x2bd   :  { %771 = vmax.xlane.f32.xlu1 %v770_v22  ;;  %774 = vmax.xlane.f32.xlu0 %v773_v30  ;;  %v4628_v48 = vadd.f32 %v720_v39, %v704_v26 }
 0x2be   :  { %v4622_v40 = vadd.f32 %v719_v25, %v703_v29 }
 0x2bf   :  { %v782_v50 = vsel %vm176_vm1, %v4628_v48, -inf }
 0x2c0   :  { %v779_v46 = vsel %vm176_vm1, %v4622_v40, -inf }
 0x2c1   :  { %777 = vmax.xlane.f32.xlu1 %v776_v45  ;;  %780 = vmax.xlane.f32.xlu0 %v779_v46 }
 0x2c5   :  { %783 = vmax.xlane.f32.xlu1 %v782_v50 }
 0x332   :  { %v739_v51 = vpop.xlane.xlu0 %738 }
 0x333   :  { %v785_v54 = vsub.f32 %v4526_v58, %v739_v51 }
 0x335   :  { %v801_v56 = vmul.f32 1.442695, %v785_v54 }
 0x336   :  { %v742_v57 = vpop.xlane.xlu0 %741  ;;  %v745_v59 = vpop.xlane.xlu1 %744 }
 0x337   :  { %4021 = vpow2.f32 %v801_v56  ;;  %v786_v60 = vsub.f32 %v4533_v0, %v742_v57  ;;  %v787_v61 = vsub.f32 %v4538_v3, %v745_v59 }
 0x339   :  { %v803_v63 = vmul.f32 1.442695, %v786_v60  ;;  %v805_v1 = vmul.f32 1.442695, %v787_v61 }
 0x33a   :  { %v748_v4 = vpop.xlane.xlu1 %747  ;;  %v751_v6 = vpop.xlane.xlu0 %750 }
 0x33b   :  { %4023 = vpow2.f32 %v803_v63  ;;  %v788_v7 = vsub.f32 %v4547_v10, %v748_v4  ;;  %v789_v8 = vsub.f32 %v4552_v14, %v751_v6 }
 0x33c   :  { %4025 = vpow2.f32 %v805_v1 }
 0x33d   :  { %v807_v9 = vmul.f32 1.442695, %v788_v7  ;;  %v809_v58 = vmul.f32 1.442695, %v789_v8 }
 0x33e   :  { %v754_v11 = vpop.xlane.xlu1 %753  ;;  %v757_v12 = vpop.xlane.xlu0 %756 }
 0x33f   :  { %4027 = vpow2.f32 %v807_v9  ;;  %v790_v16 = vsub.f32 %v4554_v17, %v754_v11  ;;  %v791_v0 = vsub.f32 %v4566_v33, %v757_v12 }
 0x340   :  { %4029 = vpow2.f32 %v809_v58 }
 0x341   :  { %v4639_v3 = vpop.eup %4021  ;;  %v811_v21 = vmul.f32 1.442695, %v790_v16  ;;  %v813_v22 = vmul.f32 1.442695, %v791_v0 }
 0x342   :  { %v760_v25 = vpop.xlane.xlu1 %759  ;;  %v763_v26 = vpop.xlane.xlu0 %762  ;;  %v833_v10 = vsel %vm176_vm1, %v4639_v3, 0.0 }
 0x343   :  { %4031 = vpow2.f32 %v811_v21  ;;  %v792_v14 = vsub.f32 %v4575_v49, %v760_v25  ;;  %v793_v29 = vsub.f32 %v4580_v53, %v763_v26  ;;  %834 = vadd.xlane.f32.xlu0 %v833_v10 }
 0x344   :  { %4033 = vpow2.f32 %v813_v22 }
 0x345   :  { %v4645_v17 = vpop.eup %4023  ;;  %v815_v33 = vmul.f32 1.442695, %v792_v14  ;;  %v817_v30 = vmul.f32 1.442695, %v793_v29 }
 0x346   :  { %v4647_v39 = vpop.eup %4025  ;;  %v766_v45 = vpop.xlane.xlu1 %765  ;;  %v836_v50 = vsel %vm176_vm1, %v4645_v17, 0.0 }
 0x347   :  { %v769_v46 = vpop.xlane.xlu0 %768  ;;  %4035 = vpow2.f32 %v815_v33  ;;  %v794_v51 = vsub.f32 %v4589_v62, %v766_v45  ;;  %837 = vadd.xlane.f32.xlu1 %v836_v50  ;;  %v839_v53 = vsel %vm176_vm1, %v4647_v39, 0.0 }
 0x348   :  { %v795_v49 = vsub.f32 %v4594_v2, %v769_v46  ;;  %4037 = vpow2.f32 %v817_v30  ;;  %840 = vadd.xlane.f32.xlu0 %v839_v53 }
 0x349   :  { %v4655_v54 = vpop.eup %4027  ;;  %v819_v56 = vmul.f32 1.442695, %v794_v51 }
 0x34a   :  { %v821_v57 = vmul.f32 1.442695, %v795_v49  ;;  %v4657_v59 = vpop.eup %4029  ;;  %v772_v60 = vpop.xlane.xlu1 %771  ;;  %v842_v63 = vsel %vm176_vm1, %v4655_v54, 0.0 }
 0x34b   :  { %v775_v61 = vpop.xlane.xlu0 %774  ;;  %4039 = vpow2.f32 %v819_v56  ;;  %v796_v62 = vsub.f32 %v4596_v5, %v772_v60  ;;  %843 = vadd.xlane.f32.xlu1 %v842_v63  ;;  %v845_v1 = vsel %vm176_vm1, %v4657_v59, 0.0  ;;  %v151_v63 = vld [vmem:[%s5440_s2 + $0x78] sm:$0xff] }
 0x34c   :  { %v797_v2 = vsub.f32 %v4608_v18, %v775_v61  ;;  %4041 = vpow2.f32 %v821_v57  ;;  %846 = vadd.xlane.f32.xlu0 %v845_v1  ;;  %v150_v61 = vld [vmem:[%s5440_s2 + $0x70] sm:$0xff] }
 0x34d   :  { %v4665_v4 = vpop.eup %4031  ;;  %v823_v6 = vmul.f32 1.442695, %v796_v62  ;;  %v3910_v62 = vpack.c.bf16 %v151_v63, %v150_v61 }
 0x34e   :  { %v825_v7 = vmul.f32 1.442695, %v797_v2  ;;  %v4667_v8 = vpop.eup %4033  ;;  %v778_v9 = vpop.xlane.xlu1 %777  ;;  %v848_v11 = vsel %vm176_vm1, %v4665_v4, 0.0 }
 0x34f   :  { %v781_v58 = vpop.xlane.xlu0 %780  ;;  %4043 = vpow2.f32 %v823_v6  ;;  %v798_v5 = vsub.f32 %v4617_v35, %v778_v9  ;;  %849 = vadd.xlane.f32.xlu1 %v848_v11  ;;  %v851_v12 = vsel %vm176_vm1, %v4667_v8, 0.0  ;;  %3911 = vmatprep.subr.bf16.mxu1 %v3910_v62 }
 0x350   :  { %v799_v18 = vsub.f32 %v4622_v40, %v781_v58  ;;  %4045 = vpow2.f32 %v825_v7  ;;  %852 = vadd.xlane.f32.xlu0 %v851_v12 }
 0x351   :  { %v4675_v16 = vpop.eup %4035  ;;  %v827_v0 = vmul.f32 1.442695, %v798_v5 }
 0x352   :  { %v829_v21 = vmul.f32 1.442695, %v799_v18  ;;  %v4677_v22 = vpop.eup %4037  ;;  %v784_v25 = vpop.xlane.xlu1 %783  ;;  %v854_v26 = vsel %vm176_vm1, %v4675_v16, 0.0 }
 0x353   :  { %4047 = vpow2.f32 %v827_v0  ;;  %v800_v35 = vsub.f32 %v4628_v48, %v784_v25  ;;  %855 = vadd.xlane.f32.xlu1 %v854_v26  ;;  %v857_v40 = vsel %vm176_vm1, %v4677_v22, 0.0 }
 0x354   :  { %4049 = vpow2.f32 %v829_v21  ;;  %858 = vadd.xlane.f32.xlu0 %v857_v40 }
 0x355   :  { %v4684_v10 = vpop.eup %4039  ;;  %v831_v14 = vmul.f32 1.442695, %v800_v35 }
 0x356   :  { %v4686_v29 = vpop.eup %4041  ;;  %v860_v33 = vsel %vm176_vm1, %v4684_v10, 0.0 }
 0x357   :  { %4051 = vpow2.f32 %v831_v14  ;;  %861 = vadd.xlane.f32.xlu1 %v860_v33  ;;  %v863_v30 = vsel %vm176_vm1, %v4686_v29, 0.0 }
 0x358   :  { %864 = vadd.xlane.f32.xlu0 %v863_v30 }
 0x359   :  { %v4692_v48 = vpop.eup %4043 }
 0x35a   :  { %v4694_v45 = vpop.eup %4045  ;;  %v866_v46 = vsel %vm176_vm1, %v4692_v48, 0.0 }
 0x35b   :  { %867 = vadd.xlane.f32.xlu1 %v866_v46  ;;  %v869_v50 = vsel %vm176_vm1, %v4694_v45, 0.0 }
 0x35c   :  { %870 = vadd.xlane.f32.xlu0 %v869_v50 }
 0x35d   :  { %v4700_v51 = vpop.eup %4047 }
 0x35e   :  { %v4702_v49 = vpop.eup %4049  ;;  %v872_v53 = vsel %vm176_vm1, %v4700_v51, 0.0 }
 0x35f   :  { %873 = vadd.xlane.f32.xlu1 %v872_v53  ;;  %v875_v56 = vsel %vm176_vm1, %v4702_v49, 0.0 }
 0x360   :  { %876 = vadd.xlane.f32.xlu0 %v875_v56 }
 0x361   :  { %v4708_v57 = vpop.eup %4051 }
 0x362   :  { %v878_v60 = vsel %vm176_vm1, %v4708_v57, 0.0 }
 0x363   :  { %879 = vadd.xlane.f32.xlu1 %v878_v60 }
 0x3d0   :  { %v835_v2 = vpop.xlane.xlu0 %834 }
 0x3d1   :  { %4053 = vrcp.f32 %v835_v2 }
 0x3d4   :  { %v838_v1 = vpop.xlane.xlu1 %837 }
 0x3d5   :  { %4055 = vrcp.f32 %v838_v1  ;;  %v841_v6 = vpop.xlane.xlu0 %840 }
 0x3d6   :  { %4057 = vrcp.f32 %v841_v6 }
 0x3d8   :  { %v844_v7 = vpop.xlane.xlu1 %843 }
 0x3d9   :  { %4059 = vrcp.f32 %v844_v7  ;;  %v847_v9 = vpop.xlane.xlu0 %846 }
 0x3da   :  { %4061 = vrcp.f32 %v847_v9 }
 0x3db   :  { %v4054_v58 = vpop.eup %4053 }
 0x3dc   :  { %v850_v11 = vpop.xlane.xlu1 %849  ;;  %v897_v5 = vmul.f32 %v4054_v58, %v4639_v3 }
 0x3dd   :  { %4063 = vrcp.f32 %v850_v11  ;;  %v853_v18 = vpop.xlane.xlu0 %852 }
 0x3de   :  { %4065 = vrcp.f32 %v853_v18  ;;  %3626 = vmatprep.mubr.msk.f32.mxu1 %vm176_vm1, %v897_v5 }
 0x3df   :  { %v4056_v12 = vpop.eup %4055 }
 0x3e0   :  { %v4058_v0 = vpop.eup %4057  ;;  %v898_v21 = vmul.f32 %v4056_v12, %v4645_v17  ;;  %v856_v25 = vpop.xlane.xlu1 %855 }
 0x3e1   :  { %4067 = vrcp.f32 %v856_v25  ;;  %v859_v26 = vpop.xlane.xlu0 %858  ;;  %v899_v35 = vmul.f32 %v4058_v0, %v4647_v39 }
 0x3e2   :  { %4069 = vrcp.f32 %v859_v26  ;;  %3627 = vmatmul.mubr.msk.f32.vlgmr.msra.gmra.mrb[8].mxu1 %vm176_vm1, %v898_v21 }
 0x3e3   :  { %v4060_v40 = vpop.eup %4059  ;;  %3629 = vmatprep.mubr.msk.f32.mxu1 %vm176_vm1, %v899_v35  ;;  %3913 = vmatpush3.bf16.msra.mxu1 %v3910_v62 }
 0x3e4   :  { %v4062_v3 = vpop.eup %4061  ;;  %v862_v14 = vpop.xlane.xlu1 %861  ;;  %v900_v33 = vmul.f32 %v4060_v40, %v4655_v54 }
 0x3e5   :  { %4071 = vrcp.f32 %v862_v14  ;;  %v865_v30 = vpop.xlane.xlu0 %864  ;;  %v901_v17 = vmul.f32 %v4062_v3, %v4657_v59 }
 0x3e6   :  { %4073 = vrcp.f32 %v865_v30  ;;  %3630 = vmatmul.mubr.msk.f32.gmra.mrb[10].mxu1 %vm176_vm1, %v900_v33 }
 0x3e7   :  { %v4064_v46 = vpop.eup %4063  ;;  %3632 = vmatprep.mubr.msk.f32.mxu1 %vm176_vm1, %v901_v17 }
 0x3e8   :  { %v4066_v39 = vpop.eup %4065  ;;  %v868_v50 = vpop.xlane.xlu1 %867  ;;  %v902_v53 = vmul.f32 %v4064_v46, %v4665_v4 }
 0x3e9   :  { %4075 = vrcp.f32 %v868_v50  ;;  %v871_v56 = vpop.xlane.xlu0 %870  ;;  %v903_v60 = vmul.f32 %v4066_v39, %v4667_v8 }
 0x3ea   :  { %4077 = vrcp.f32 %v871_v56  ;;  %3633 = vmatmul.mubr.msk.f32.gmra.mrb[12].mxu1 %vm176_vm1, %v902_v53 }
 0x3eb   :  { %v4068_v54 = vpop.eup %4067  ;;  %3635 = vmatprep.mubr.msk.f32.mxu1 %vm176_vm1, %v903_v60 }
 0x3ec   :  { %v4070_v59 = vpop.eup %4069  ;;  %v874_v61 = vpop.xlane.xlu1 %873  ;;  %v904_v63 = vmul.f32 %v4068_v54, %v4675_v16 }
 0x3ed   :  { %4079 = vrcp.f32 %v874_v61  ;;  %v877_v62 = vpop.xlane.xlu0 %876  ;;  %v905_v2 = vmul.f32 %v4070_v59, %v4677_v22 }
 0x3ee   :  { %4081 = vrcp.f32 %v877_v62  ;;  %3636 = vmatmul.mubr.msk.f32.gmra.mrb[14].mxu1 %vm176_vm1, %v904_v63 }
 0x3ef   :  { %v4072_v4 = vpop.eup %4071  ;;  %3638 = vmatprep.mubr.msk.f32.mxu1 %vm176_vm1, %v905_v2 }
 0x3f0   :  { %v4074_v8 = vpop.eup %4073  ;;  %v880_v1 = vpop.xlane.xlu1 %879  ;;  %v906_v6 = vmul.f32 %v4072_v4, %v4684_v10 }
 0x3f1   :  { %4083 = vrcp.f32 %v880_v1  ;;  %v907_v7 = vmul.f32 %v4074_v8, %v4686_v29 }
 0x3f2   :  { %3639 = vmatmul.mubr.msk.f32.gmra.mrb[16].mxu1 %vm176_vm1, %v906_v6 }
 0x3f3   :  { %v4076_v16 = vpop.eup %4075  ;;  %3641 = vmatprep.mubr.msk.f32.mxu1 %vm176_vm1, %v907_v7 }
 0x3f4   :  { %v4078_v9 = vpop.eup %4077  ;;  %v908_v22 = vmul.f32 %v4076_v16, %v4692_v48  ;;  %v152_v48 = vld [vmem:[%s5440_s2 + $0x80] sm:$0xff] }
 0x3f5   :  { %v909_v58 = vmul.f32 %v4078_v9, %v4694_v45  ;;  %v153_v45 = vld [vmem:[%s5440_s2 + $0x88] sm:$0xff] }
 0x3f6   :  { %3642 = vmatmul.mubr.msk.f32.gmra.mrb[18].mxu1 %vm176_vm1, %v908_v22 }
 0x3f7   :  { %v4080_v11 = vpop.eup %4079  ;;  %3644 = vmatprep.mubr.msk.f32.mxu1 %vm176_vm1, %v909_v58 }
 0x3f8   :  { %v4082_v5 = vpop.eup %4081  ;;  %v910_v10 = vmul.f32 %v4080_v11, %v4700_v51  ;;  %v3914_v51 = vpack.c.bf16 %v153_v45, %v152_v48 }
 0x3f9   :  { %v911_v29 = vmul.f32 %v4082_v5, %v4702_v49 }
 0x3fa   :  { %3645 = vmatmul.mubr.msk.f32.gmra.mrb[20].mxu1 %vm176_vm1, %v910_v10  ;;  %3915 = vmatprep.subr.bf16.mxu1 %v3914_v51 }
 0x3fb   :  { %v4084_v18 = vpop.eup %4083  ;;  %3647 = vmatprep.mubr.msk.f32.mxu1 %vm176_vm1, %v911_v29  ;;  %3917 = vmatpush3.bf16.msra.mxu1 %v3914_v51 }
 0x3fc   :  { %v912_v12 = vmul.f32 %v4084_v18, %v4708_v57 }
 0x3fe   :  { %3648 = vmatmul.mubr.msk.f32.gmra.mrb[22].mxu1 %vm176_vm1, %v912_v12 }
 0x4b5   :  { %v3628_v49 = vpop.f32.mrb[8].mxu1 }
 0x4b6   :  { %v1027_v0 = vpop.f32.mrb[9].mxu1  ;;  %v1107_v57 = vmul.f32 %v3628_v49, %v4415_v13 }
 0x4b7   :  { %v1106_v3 = vmul.f32 %v1027_v0, %v4388_v52  ;;  %v155_v0 = vld [vmem:[%s5440_s2 + $0x98] sm:$0xff] }
 0x4b9   :  { %v3631_v21 = vpop.f32.mrb[10].mxu1 }
 0x4ba   :  { %v1037_v25 = vpop.f32.mrb[11].mxu1  ;;  %v1109_v46 = vmul.f32 %v3631_v21, %v4427_v19 }
 0x4bb   :  { %v1108_v53 = vmul.f32 %v1037_v25, %v4420_v15 }
 0x4bd   :  { %v3634_v26 = vpop.f32.mrb[12].mxu1 }
 0x4be   :  { %v1111_v35 = vmul.f32 %v3634_v26, %v4442_v23  ;;  %v1047_v40 = vpop.f32.mrb[13].mxu1 }
 0x4bf   :  { %v1110_v14 = vmul.f32 %v1047_v40, %v4433_v20 }
 0x4c0   :  { %v1123_v33 = vadd.f32 %v1111_v35, %v1107_v57 }
 0x4c1   :  { %v1122_v30 = vadd.f32 %v1110_v14, %v1106_v3  ;;  %v3637_v17 = vpop.f32.mrb[14].mxu1 }
 0x4c2   :  { %v1113_v39 = vmul.f32 %v3637_v17, %v4456_v27  ;;  %v1057_v50 = vpop.f32.mrb[15].mxu1 }
 0x4c3   :  { %v1112_v56 = vmul.f32 %v1057_v50, %v4448_v24 }
 0x4c4   :  { %v1125_v13 = vadd.f32 %v1113_v39, %v1109_v46 }
 0x4c5   :  { %v1124_v60 = vadd.f32 %v1112_v56, %v1108_v53  ;;  %v3640_v23 = vpop.f32.mrb[16].mxu1 }
 0x4c6   :  { %v1115_v54 = vmul.f32 %v3640_v23, %v4471_v31  ;;  %v1067_v52 = vpop.f32.mrb[17].mxu1 }
 0x4c7   :  { %v1114_v20 = vmul.f32 %v1067_v52, %v4462_v28  ;;  %v157_v52 = vld [vmem:[%s5440_s2 + $0xa8] sm:$0xff] }
 0x4c8   :  { %v1127_v59 = vadd.f32 %v1123_v33, %v1115_v54  ;;  %v156_v54 = vld [vmem:[%s5440_s2 + $0xa0] sm:$0xff] }
 0x4c9   :  { %v1126_v61 = vadd.f32 %v1122_v30, %v1114_v20  ;;  %v3643_v63 = vpop.f32.mrb[18].mxu1  ;;  %v3922_v20 = vpack.c.bf16 %v157_v52, %v156_v54 }
 0x4ca   :  { %v1117_v19 = vmul.f32 %v3643_v63, %v4485_v36  ;;  %v1077_v62 = vpop.f32.mrb[19].mxu1 }
 0x4cb   :  { %v1116_v27 = vmul.f32 %v1077_v62, %v4477_v32 }
 0x4cc   :  { %v1129_v2 = vadd.f32 %v1125_v13, %v1117_v19 }
 0x4cd   :  { %v1128_v15 = vadd.f32 %v1124_v60, %v1116_v27  ;;  %v3646_v4 = vpop.f32.mrb[20].mxu1 }
 0x4ce   :  { %v1119_v24 = vmul.f32 %v3646_v4, %v4500_v41  ;;  %v1087_v8 = vpop.f32.mrb[21].mxu1 }
 0x4cf   :  { %v1118_v1 = vmul.f32 %v1087_v8, %v4491_v38  ;;  %v3246_v38 = vld [vmem:[%s5440_s2 + $0xd3] ss:$0 sm:$0xff] }
 0x4d0   :  { %v1131_v31 = vadd.f32 %v1127_v59, %v1119_v24  ;;  %v158_v59 = vld [vmem:[%s5440_s2 + $0xb0] sm:$0xff] }
 0x4d1   :  { %v1130_v6 = vadd.f32 %v1126_v61, %v1118_v1  ;;  %v3649_v7 = vpop.f32.mrb[22].mxu1  ;;  %v159_v61 = vld [vmem:[%s5440_s2 + $0xb8] sm:$0xff] }
 0x4d2   :  { %v1121_v28 = vmul.f32 %v3649_v7, %v4514_v47  ;;  %v1097_v16 = vpop.f32.mrb[23].mxu1  ;;  %v3926_v63 = vpack.c.bf16 %v159_v61, %v158_v59 }
 0x4d3   :  { %v1120_v9 = vmul.f32 %v1097_v16, %v4506_v42  ;;  %3658 = vmatprep.mubr.msk.f32.mxu1 %vm176_vm1, %v1130_v6  ;;  %v3251_v16 = vld [vmem:[%s5440_s2 + $0xd6] ss:$0 sm:$0xff] }
 0x4d4   :  { %v1133_v36 = vadd.f32 %v1129_v2, %v1121_v28  ;;  %3659 = vmatmul.mubr.msk.f32.vlgmr.msra.gmra.mrb[24].mxu1 %vm176_vm1, %v1131_v31  ;;  %3927 = vmatprep.subr.bf16.mxu1 %v3926_v63 }
 0x4d5   :  { %v1132_v32 = vadd.f32 %v1128_v15, %v1120_v9  ;;  %3929 = vmatpush3.bf16.msra.mxu1 %v3926_v63 }
 0x4d7   :  { %3661 = vmatprep.mubr.msk.f32.mxu1 %vm176_vm1, %v1132_v32 }
 0x4d8   :  { %3662 = vmatmul.mubr.msk.f32.gmra.mrb[26].mxu1 %vm176_vm1, %v1133_v36 }
 0x5a7   :  { %v3660_v41 = vpop.f32.mrb[24].mxu1 }
 0x5a8   :  { %v1222_v22 = vadd.f32 %v3660_v41, %v3246_v38  ;;  %v1216_v47 = vpop.f32.mrb[25].mxu1 }
 0x5a9   :  { %v1217_v58 = vadd.f32 %v3246_v38, %v1216_v47 }
 0x5aa   :  { %v1236_v42 = vadd.f32 %v1222_v22, %v4346_v37 }
 0x5ab   :  { %v3663_v11 = vpop.f32.mrb[26].mxu1  ;;  %v1235_v5 = vadd.f32 %v1217_v58, %v4341_v34  ;;  %v154_v34 = vld [vmem:[%s5440_s2 + $0x90] sm:$0xff] }
 0x5ac   :  { %v1232_v10 = vadd.f32 %v3663_v11, %v3246_v38  ;;  %v1226_v29 = vpop.f32.mrb[27].mxu1  ;;  %v1242_v18 = vsel %vm176_vm1, %v1236_v42, 0.0  ;;  %v3918_v21 = vpack.c.bf16 %v155_v0, %v154_v34 }
 0x5ad   :  { %v1227_v12 = vadd.f32 %v3246_v38, %v1226_v29  ;;  %1243 = vadd.xlane.f32.xlu1 %v1242_v18  ;;  %v1239_v48 = vsel %vm176_vm1, %v1235_v5, 0.0  ;;  %v3252_v38 = vld [vmem:[%s5440_s2 + $0xd7] ss:$0 sm:$0xff] }
 0x5ae   :  { %1240 = vadd.xlane.f32.xlu0 %v1239_v48  ;;  %v1238_v45 = vadd.f32 %v1232_v10, %v4355_v43  ;;  %3919 = vmatprep.subr.bf16.mxu0 %v3918_v21 }
 0x5af   :  { %v1237_v51 = vadd.f32 %v1227_v12, %v4361_v44  ;;  %3921 = vmatpush3.bf16.msra.mxu0 %v3918_v21 }
 0x5b0   :  { %v1248_v49 = vsel %vm176_vm1, %v1238_v45, 0.0  ;;  %3923 = vmatprep.subr.bf16.mxu0 %v3922_v20 }
 0x5b1   :  { %1249 = vadd.xlane.f32.xlu1 %v1248_v49  ;;  %v1245_v37 = vsel %vm176_vm1, %v1237_v51, 0.0 }
 0x5b2   :  { %1246 = vadd.xlane.f32.xlu0 %v1245_v37  ;;  %v3253_v37 = vld [vmem:[%s5440_s2 + $0xd4] ss:$0 sm:$0xff] }
 0x5b3   :  { %3925 = vmatpush3.bf16.msra.mxu0 %v3922_v20 }
 0x63a   :  { %v1244_v43 = vpop.xlane.xlu1 %1243 }
 0x63b   :  { %v1253_v25 = vmul.f32 0.03125, %v1244_v43  ;;  %v1241_v44 = vpop.xlane.xlu0 %1240 }
 0x63c   :  { %v1252_v26 = vmul.f32 0.03125, %v1241_v44 }
 0x63d   :  { %v1257_v57 = vsub.f32 %v1236_v42, %v1253_v25 }
 0x63e   :  { %v1256_v35 = vsub.f32 %v1235_v5, %v1252_v26  ;;  %v1250_v40 = vpop.xlane.xlu1 %1249 }
 0x63f   :  { %v1255_v3 = vmul.f32 0.03125, %v1250_v40  ;;  %v1247_v14 = vpop.xlane.xlu0 %1246  ;;  %v1261_v33 = vmul.f32 %v1257_v57, %v1257_v57 }
 0x640   :  { %v1254_v30 = vmul.f32 0.03125, %v1247_v14  ;;  %v1260_v17 = vmul.f32 %v1256_v35, %v1256_v35 }
 0x641   :  { %v1259_v46 = vsub.f32 %v1238_v45, %v1255_v3  ;;  %v1267_v39 = vsel %vm176_vm1, %v1261_v33, 0.0  ;;  %v160_v45 = vld [vmem:[%s5440_s2 + $0xc0] sm:$0xff]  ;;  %v3258_v33 = vld [vmem:[%s5440_s2 + $0xd5] ss:$0 sm:$0xff] }
 0x642   :  { %v1258_v50 = vsub.f32 %v1237_v51, %v1254_v30  ;;  %1268 = vadd.xlane.f32.xlu1 %v1267_v39  ;;  %v1264_v53 = vsel %vm176_vm1, %v1260_v17, 0.0  ;;  %v161_v51 = vld [vmem:[%s5440_s2 + $0xc8] sm:$0xff] }
 0x643   :  { %1265 = vadd.xlane.f32.xlu0 %v1264_v53  ;;  %v1263_v56 = vmul.f32 %v1259_v46, %v1259_v46  ;;  %v3930_v49 = vpack.c.bf16 %v161_v51, %v160_v45  ;;  %v1593_v45 = vld [vmem:[%s5440_s2 + $0x118] sm:$0xff] }
 0x644   :  { %v1262_v13 = vmul.f32 %v1258_v50, %v1258_v50 }
 0x645   :  { %v1273_v60 = vsel %vm176_vm1, %v1263_v56, 0.0  ;;  %3931 = vmatprep.subr.bf16.mxu1 %v3930_v49 }
 0x646   :  { %1274 = vadd.xlane.f32.xlu1 %v1273_v60  ;;  %v1270_v23 = vsel %vm176_vm1, %v1262_v13, 0.0  ;;  %3933 = vmatpush3.bf16.msra.mxu1 %v3930_v49  ;;  %v1594_v49 = vld [vmem:[%s5440_s2 + $0x120] sm:$0xff] }
 0x647   :  { %1271 = vadd.xlane.f32.xlu0 %v1270_v23 }
 0x6cf   :  { %v1269_v19 = vpop.xlane.xlu1 %1268 }
 0x6d0   :  { %v1277_v62 = vmul.f32 0.03125, %v1269_v19  ;;  %v1266_v27 = vpop.xlane.xlu0 %1265 }
 0x6d1   :  { %v1276_v2 = vmul.f32 0.03125, %v1266_v27 }
 0x6d2   :  { %v1281_v15 = vadd.f32 1e-05, %v1277_v62 }
 0x6d3   :  { %v1280_v4 = vadd.f32 1e-05, %v1276_v2  ;;  %v1275_v24 = vpop.xlane.xlu1 %1274 }
 0x6d4   :  { %4085 = vrsqrt.f32 %v1281_v15  ;;  %v1279_v8 = vmul.f32 0.03125, %v1275_v24  ;;  %v1272_v1 = vpop.xlane.xlu0 %1271 }
 0x6d5   :  { %4087 = vrsqrt.f32 %v1280_v4  ;;  %v1278_v31 = vmul.f32 0.03125, %v1272_v1 }
 0x6d6   :  { %v1283_v6 = vadd.f32 1e-05, %v1279_v8 }
 0x6d7   :  { %v1282_v7 = vadd.f32 1e-05, %v1278_v31 }
 0x6d8   :  { %4089 = vrsqrt.f32 %v1283_v6 }
 0x6d9   :  { %4091 = vrsqrt.f32 %v1282_v7 }
 0x6de   :  { %v4086_v28 = vpop.eup %4085 }
 0x6df   :  { %v4088_v9 = vpop.eup %4087  ;;  %v1289_v36 = vmul.f32 %v4086_v28, %v1257_v57 }
 0x6e0   :  { %v1288_v32 = vmul.f32 %v4088_v9, %v1256_v35 }
 0x6e1   :  { %v1297_v41 = vmul.f32 %v3251_v16, %v1289_v36 }
 0x6e2   :  { %v4090_v22 = vpop.eup %4089  ;;  %v1296_v47 = vmul.f32 %v3251_v16, %v1288_v32 }
 0x6e3   :  { %v4092_v58 = vpop.eup %4091  ;;  %v1291_v42 = vmul.f32 %v4090_v22, %v1259_v46  ;;  %v1305_v10 = vadd.f32 %v3252_v38, %v1297_v41 }
 0x6e4   :  { %v1304_v11 = vadd.f32 %v3252_v38, %v1296_v47  ;;  %v1290_v5 = vmul.f32 %v4092_v58, %v1258_v50  ;;  %v1586_v47 = vld [vmem:[%s5440_s2 + $0xe0] sm:$0xff]  ;;  %v1587_v58 = vld [vmem:[%s5440_s2 + $0xe8] sm:$0xff] }
 0x6e5   :  { %v1299_v29 = vmul.f32 %v3251_v16, %v1291_v42  ;;  %v1590_v42 = vld [vmem:[%s5440_s2 + $0x100] sm:$0xff] }
 0x6e6   :  { %3672 = vmatprep.mubr.msk.f32.mxu0 %vm176_vm1, %v1304_v11  ;;  %v1298_v18 = vmul.f32 %v3251_v16, %v1290_v5  ;;  %v1591_v5 = vld [vmem:[%s5440_s2 + $0x108] sm:$0xff] }
 0x6e7   :  { %3673 = vmatmul.mubr.msk.f32.vlgmr.msra.gmra.mrb[24].mxu0 %vm176_vm1, %v1305_v10  ;;  %v1307_v48 = vadd.f32 %v3252_v38, %v1299_v29  ;;  %v1588_v29 = vld [vmem:[%s5440_s2 + $0xf0] sm:$0xff] }
 0x6e8   :  { %v1306_v12 = vadd.f32 %v3252_v38, %v1298_v18  ;;  %v1589_v18 = vld [vmem:[%s5440_s2 + $0xf8] sm:$0xff] }
 0x6ea   :  { %3675 = vmatprep.mubr.msk.f32.mxu0 %vm176_vm1, %v1306_v12 }
 0x6eb   :  { %3676 = vmatmul.mubr.msk.f32.gmra.mrb[26].mxu0 %vm176_vm1, %v1307_v48 }
 0x7ba   :  { %v3674_v34 = vpop.f32.mrb[24].mxu0 }
 0x7bb   :  { %v1396_v0 = vadd.f32 %v3674_v34, %v3253_v37  ;;  %v1390_v21 = vpop.f32.mrb[25].mxu0 }
 0x7bc   :  { %v1391_v43 = vadd.f32 %v3253_v37, %v1390_v21 }
 0x7bd   :  { %v1410_v26 = vmax.f32 %v1396_v0, 0.0 }
 0x7be   :  { %v1409_v25 = vmax.f32 %v1391_v43, 0.0  ;;  %v3677_v44 = vpop.f32.mrb[26].mxu0 }
 0x7bf   :  { %v1406_v57 = vadd.f32 %v3677_v44, %v3253_v37  ;;  %v1400_v35 = vpop.f32.mrb[27].mxu0 }
 0x7c0   :  { %v1401_v40 = vadd.f32 %v3253_v37, %v1400_v35  ;;  %3686 = vmatprep.mubr.msk.f32.mxu1 %vm176_vm1, %v1409_v25  ;;  %v1595_v37 = vld [vmem:[%s5440_s2 + $0x128] sm:$0xff] }
 0x7c1   :  { %3687 = vmatmul.mubr.msk.f32.vlgmr.msra.gmra.mrb[28].mxu1 %vm176_vm1, %v1410_v26  ;;  %v1412_v14 = vmax.f32 %v1406_v57, 0.0  ;;  %v3950_v34 = vpack.c.bf16 %v1595_v37, %v1594_v49 }
 0x7c2   :  { %v1411_v3 = vmax.f32 %v1401_v40, 0.0 }
 0x7c4   :  { %3689 = vmatprep.mubr.msk.f32.mxu1 %vm176_vm1, %v1411_v3 }
 0x7c5   :  { %3690 = vmatmul.mubr.msk.f32.gmra.mrb[30].mxu1 %vm176_vm1, %v1412_v14 }
 0x894   :  { %v3688_v30 = vpop.f32.mrb[28].mxu1 }
 0x895   :  { %v1501_v17 = vadd.f32 %v3688_v30, %v3258_v33  ;;  %v1495_v46 = vpop.f32.mrb[29].mxu1 }
 0x896   :  { %v1496_v39 = vadd.f32 %v3258_v33, %v1495_v46 }
 0x897   :  { %v1515_v50 = vadd.f32 %v1501_v17, %v1305_v10  ;;  %v3942_v10 = vpack.c.bf16 %v1591_v5, %v1590_v42  ;;  %v3263_v17 = vld [vmem:[%s5440_s2 + $0xd8] ss:$0 sm:$0xff] }
 0x898   :  { %v3691_v53 = vpop.f32.mrb[30].mxu1  ;;  %v1514_v56 = vadd.f32 %v1496_v39, %v1304_v11  ;;  %v3934_v11 = vpack.c.bf16 %v1587_v58, %v1586_v47 }
 0x899   :  { %v1511_v13 = vadd.f32 %v3691_v53, %v3258_v33  ;;  %v1505_v60 = vpop.f32.mrb[31].mxu1  ;;  %v1521_v23 = vsel %vm176_vm1, %v1515_v50, 0.0  ;;  %3943 = vmatprep.subr.bf16.mxu1 %v3942_v10  ;;  %v3264_v53 = vld [vmem:[%s5440_s2 + $0xd9] ss:$0 sm:$0xff] }
 0x89a   :  { %v1506_v54 = vadd.f32 %v3258_v33, %v1505_v60  ;;  %1522 = vadd.xlane.f32.xlu1 %v1521_v23  ;;  %v1518_v52 = vsel %vm176_vm1, %v1514_v56, 0.0  ;;  %3935 = vmatprep.subr.bf16.mxu0 %v3934_v11  ;;  %v1596_v23 = vld [vmem:[%s5440_s2 + $0x130] sm:$0xff] }
 0x89b   :  { %1519 = vadd.xlane.f32.xlu0 %v1518_v52  ;;  %v1517_v20 = vadd.f32 %v1511_v13, %v1307_v48  ;;  %v3938_v48 = vpack.c.bf16 %v1589_v18, %v1588_v29  ;;  %3937 = vmatpush3.bf16.msra.mxu0 %v3934_v11  ;;  %v3275_v11 = vld [vmem:[%s5440_s2 + $0x1a2] ss:$0 sm:$0xff] }
 0x89c   :  { %v1516_v59 = vadd.f32 %v1506_v54, %v1306_v12  ;;  %v1592_v12 = vld [vmem:[%s5440_s2 + $0x110] sm:$0xff]  ;;  %3945 = vmatpush3.bf16.msra.mxu1 %v3942_v10  ;;  %v1597_v54 = vld [vmem:[%s5440_s2 + $0x138] sm:$0xff] }
 0x89d   :  { %v1527_v61 = vsel %vm176_vm1, %v1517_v20, 0.0  ;;  %v3946_v51 = vpack.c.bf16 %v1593_v45, %v1592_v12  ;;  %3939 = vmatprep.subr.bf16.mxu0 %v3938_v48 }
 0x89e   :  { %1528 = vadd.xlane.f32.xlu1 %v1527_v61  ;;  %v1524_v63 = vsel %vm176_vm1, %v1516_v59, 0.0 }
 0x89f   :  { %1525 = vadd.xlane.f32.xlu0 %v1524_v63  ;;  %3947 = vmatprep.subr.bf16.mxu1 %v3946_v51 }
 0x8a0   :  { %3941 = vmatpush3.bf16.msra.mxu0 %v3938_v48  ;;  %3949 = vmatpush3.bf16.msra.mxu1 %v3946_v51 }
 0x8a1   :  { %3951 = vmatprep.subr.bf16.mxu0 %v3950_v34 }
 0x927   :  { %v1523_v19 = vpop.xlane.xlu1 %1522 }
 0x928   :  { %v1531_v62 = vmul.f32 0.03125, %v1523_v19  ;;  %v1520_v27 = vpop.xlane.xlu0 %1519 }
 0x929   :  { %v1530_v2 = vmul.f32 0.03125, %v1520_v27 }
 0x92a   :  { %v4839_v15 = vsub.f32 %v1515_v50, %v1531_v62  ;;  %v3954_v62 = vpack.c.bf16 %v1597_v54, %v1596_v23  ;;  %v5039_v54 = vld [vmem:[%s5439_s1 + $0x98] sm:$0xff] }
 0x92b   :  { %v4841_v4 = vsub.f32 %v1514_v56, %v1530_v2  ;;  %v1529_v24 = vpop.xlane.xlu1 %1528 }
 0x92c   :  { %v1533_v8 = vmul.f32 0.03125, %v1529_v24  ;;  %v1526_v1 = vpop.xlane.xlu0 %1525  ;;  %v1539_v31 = vmul.f32 %v4839_v15, %v4839_v15  ;;  %v3265_v24 = vld [vmem:[%s5440_s2 + $0x1a0] ss:$0 sm:$0xff] }
 0x92d   :  { %v1532_v6 = vmul.f32 0.03125, %v1526_v1  ;;  %v1538_v7 = vmul.f32 %v4841_v4, %v4841_v4 }
 0x92e   :  { %v4847_v28 = vsub.f32 %v1517_v20, %v1533_v8  ;;  %v1545_v16 = vsel %vm176_vm1, %v1539_v31, 0.0 }
 0x92f   :  { %v4850_v9 = vsub.f32 %v1516_v59, %v1532_v6  ;;  %1546 = vadd.xlane.f32.xlu1 %v1545_v16  ;;  %v1542_v36 = vsel %vm176_vm1, %v1538_v7, 0.0 }
 0x930   :  { %1543 = vadd.xlane.f32.xlu0 %v1542_v36  ;;  %v1541_v32 = vmul.f32 %v4847_v28, %v4847_v28 }
 0x931   :  { %v1540_v38 = vmul.f32 %v4850_v9, %v4850_v9 }
 0x932   :  { %v1551_v41 = vsel %vm176_vm1, %v1541_v32, 0.0 }
 0x933   :  { %1552 = vadd.xlane.f32.xlu1 %v1551_v41  ;;  %v1548_v22 = vsel %vm176_vm1, %v1540_v38, 0.0  ;;  %v4948_v38 = vld [vmem:[%s5439_s1 + $0x40] sm:$0xff] }
 0x934   :  { %1549 = vadd.xlane.f32.xlu0 %v1548_v22 }
 0x9bc   :  { %v1547_v0 = vpop.xlane.xlu1 %1546 }
 0x9bd   :  { %v1555_v21 = vmul.f32 0.03125, %v1547_v0  ;;  %v1544_v43 = vpop.xlane.xlu0 %1543 }
 0x9be   :  { %v1554_v25 = vmul.f32 0.03125, %v1544_v43  ;;  %v4967_v43 = vld [vmem:[%s5439_s1 + $0x48] sm:$0xff] }
 0x9bf   :  { %v1559_v44 = vadd.f32 1e-05, %v1555_v21 }
 0x9c0   :  { %v1558_v26 = vadd.f32 1e-05, %v1554_v25  ;;  %v1553_v57 = vpop.xlane.xlu1 %1552 }
 0x9c1   :  { %4093 = vrsqrt.f32 %v1559_v44  ;;  %v1557_v35 = vmul.f32 0.03125, %v1553_v57  ;;  %v1550_v40 = vpop.xlane.xlu0 %1549  ;;  %v4981_v57 = vld [vmem:[%s5439_s1 + $0x58] sm:$0xff] }
 0x9c2   :  { %4095 = vrsqrt.f32 %v1558_v26  ;;  %v1556_v3 = vmul.f32 0.03125, %v1550_v40  ;;  %v4973_v26 = vld [vmem:[%s5439_s1 + $0x50] sm:$0xff]  ;;  %v4987_v40 = vld [vmem:[%s5439_s1 + $0x60] sm:$0xff] }
 0x9c3   :  { %v1561_v14 = vadd.f32 1e-05, %v1557_v35 }
 0x9c4   :  { %v1560_v33 = vadd.f32 1e-05, %v1556_v3 }
 0x9c5   :  { %4097 = vrsqrt.f32 %v1561_v14  ;;  %v4996_v14 = vld [vmem:[%s5439_s1 + $0x68] sm:$0xff] }
 0x9c6   :  { %4099 = vrsqrt.f32 %v1560_v33 }
 0x9cb   :  { %v4094_v30 = vpop.eup %4093 }
 0x9cc   :  { %v4096_v46 = vpop.eup %4095  ;;  %v1567_v39 = vmul.f32 %v4094_v30, %v4839_v15  ;;  %v5002_v30 = vld [vmem:[%s5439_s1 + $0x70] sm:$0xff] }
 0x9cd   :  { %v1566_v50 = vmul.f32 %v4096_v46, %v4841_v4  ;;  %v3270_v4 = vld [vmem:[%s5440_s2 + $0x1a1] ss:$0 sm:$0xff]  ;;  %v5010_v46 = vld [vmem:[%s5439_s1 + $0x78] sm:$0xff] }
 0x9ce   :  { %v1575_v56 = vmul.f32 %v3263_v17, %v1567_v39 }
 0x9cf   :  { %v4098_v13 = vpop.eup %4097  ;;  %v1574_v60 = vmul.f32 %v3263_v17, %v1566_v50  ;;  %v5016_v50 = vld [vmem:[%s5439_s1 + $0x80] sm:$0xff] }
 0x9d0   :  { %v4100_v52 = vpop.eup %4099  ;;  %v1569_v20 = vmul.f32 %v4098_v13, %v4847_v28  ;;  %v4907_v63 = vadd.f32 %v3264_v53, %v1575_v56  ;;  %v5025_v56 = vld [vmem:[%s5439_s1 + $0x88] sm:$0xff] }
 0x9d1   :  { %v4904_v59 = vadd.f32 %v3264_v53, %v1574_v60  ;;  %v1568_v61 = vmul.f32 %v4100_v52, %v4850_v9  ;;  %v5031_v60 = vld [vmem:[%s5439_s1 + $0x90] sm:$0xff] }
 0x9d2   :  { %v1577_v19 = vmul.f32 %v3263_v17, %v1569_v20  ;;  %v5045_v20 = vld [vmem:[%s5439_s1 + $0xa0] sm:$0xff] }
 0x9d3   :  { %3700 = vmatprep.mubr.msk.f32.mxu0 %vm176_vm1, %v4904_v59  ;;  %3714 = vmatprep.mubr.msk.f32.mxu1 %vm176_vm1, %v4904_v59  ;;  %v1576_v27 = vmul.f32 %v3263_v17, %v1568_v61 }
 0x9d4   :  { %3701 = vmatmul.mubr.msk.f32.vlgmr.msra.gmra.mrb[28].mxu0 %vm176_vm1, %v4907_v63  ;;  %3715 = vmatmul.mubr.msk.f32.vlgmr.msra.gmra.mrb[32].mxu1 %vm176_vm1, %v4907_v63  ;;  %v4919_v15 = vadd.f32 %v3264_v53, %v1577_v19  ;;  %v5054_v19 = vld [vmem:[%s5439_s1 + $0xa8] sm:$0xff] }
 0x9d5   :  { %3953 = vmatpush3.bf16.msra.mxu0 %v3950_v34  ;;  %v4917_v2 = vadd.f32 %v3264_v53, %v1576_v27  ;;  %v5060_v27 = vld [vmem:[%s5439_s1 + $0xb0] sm:$0xff] }
 0x9d6   :  { %3955 = vmatprep.subr.bf16.mxu0 %v3954_v62 }
 0x9d7   :  { %3703 = vmatprep.mubr.msk.f32.mxu0 %vm176_vm1, %v4917_v2  ;;  %3717 = vmatprep.mubr.msk.f32.mxu1 %vm176_vm1, %v4917_v2 }
 0x9d8   :  { %3704 = vmatmul.mubr.msk.f32.gmra.mrb[30].mxu0 %vm176_vm1, %v4919_v15  ;;  %3718 = vmatmul.mubr.msk.f32.gmra.mrb[34].mxu1 %vm176_vm1, %v4919_v15 }
 0x9d9   :  { %3957 = vmatpush3.bf16.msra.mxu0 %v3954_v62  ;;  %3728 = vmatprep.mubr.msk.f32.mxu0 %vm176_vm1, %v4904_v59 }
 0x9dc   :  { %3729 = vmatmul.mubr.msk.f32.vlgmr.msra.gmra.mrb[32].mxu0 %vm176_vm1, %v4907_v63 }
 0x9dd   :  { %3731 = vmatprep.mubr.msk.f32.mxu0 %vm176_vm1, %v4917_v2 }
 0x9e0   :  { %3732 = vmatmul.mubr.msk.f32.gmra.mrb[34].mxu0 %vm176_vm1, %v4919_v15 }
 0xaa7   :  { %v3702_v8 = vpop.f32.mrb[28].mxu0  ;;  %v3716_v1 = vpop.f32.mrb[32].mxu1 }
 0xaa8   :  { %v1797_v31 = vadd.f32 %v3716_v1, %v3270_v4  ;;  %v1702_v6 = vpop.f32.mrb[29].mxu0  ;;  %v1791_v7 = vpop.f32.mrb[33].mxu1  ;;  %v1708_v34 = vadd.f32 %v3702_v8, %v3265_v24 }
 0xaa9   :  { %v4943_v28 = vadd.f32 %v3265_v24, %v1702_v6  ;;  %v1792_v16 = vadd.f32 %v3270_v4, %v1791_v7 }
 0xaaa   :  { %v1900_v25 = vmul.f32 %v4967_v43, %v1708_v34  ;;  %v1904_v33 = vmul.f32 %v4996_v14, %v1708_v34  ;;  %v1908_v13 = vmul.f32 %v5025_v56, %v1708_v34  ;;  %v1912_v62 = vmul.f32 %v5054_v19, %v1708_v34 }
 0xaab   :  { %v3958_v9 = vpack.c.bf16 %v1797_v31, %v1792_v16  ;;  %v3705_v36 = vpop.f32.mrb[30].mxu0  ;;  %v3719_v32 = vpop.f32.mrb[34].mxu1  ;;  %v1899_v41 = vmul.f32 %v4948_v38, %v4943_v28  ;;  %v1903_v3 = vmul.f32 %v4987_v40, %v4943_v28  ;;  %v1907_v53 = vmul.f32 %v5016_v50, %v4943_v28 }
 0xaac   :  { %v1807_v22 = vadd.f32 %v3719_v32, %v3270_v4  ;;  %v1712_v47 = vpop.f32.mrb[31].mxu0  ;;  %v1801_v58 = vpop.f32.mrb[35].mxu1  ;;  %v1718_v44 = vadd.f32 %v3705_v36, %v3265_v24  ;;  %v1911_v61 = vmul.f32 %v5045_v20, %v4943_v28  ;;  %v4197_v28 = vld [vmem:[%s5439_s1 + $0xc8] sm:$0xff]  ;;  %v4198_v36 = vld [vmem:[%s5439_s1 + $0xc0] sm:$0xff] }
 0xaad   :  { %v1802_v42 = vadd.f32 %v3270_v4, %v1801_v58  ;;  %3960 = vmatprep.subr.msk.bf16.mxu1 %vm4394_vm2, %v3958_v9  ;;  %3742 = vmatprep.mubr.msk.f32.mxu1 %vm176_vm1, %v1899_v41  ;;  %v1713_v21 = vadd.f32 %v3265_v24, %v1712_v47  ;;  %v5068_v24 = vld [vmem:[%s5439_s1 + $0xb8] sm:$0xff] }
 0xaae   :  { %3963 = vmatpush3.bf16.xpose.msk.msra.mxu1 %vm4394_vm2, %v3958_v9  ;;  %v1902_v35 = vmul.f32 %v4981_v57, %v1718_v44  ;;  %v1906_v39 = vmul.f32 %v5010_v46, %v1718_v44  ;;  %v1910_v52 = vmul.f32 %v5039_v54, %v1718_v44  ;;  %v1914_v8 = vmul.f32 %v5068_v24, %v1718_v44 }
 0xaaf   :  { %v3964_v5 = vpack.c.bf16 %v1807_v22, %v1802_v42  ;;  %v3730_v10 = vpop.f32.mrb[32].mxu0  ;;  %v1901_v55 = vmul.f32 %v4973_v26, %v1713_v21  ;;  %v1905_v17 = vmul.f32 %v5002_v30, %v1713_v21  ;;  %v1909_v23 = vmul.f32 %v5031_v60, %v1713_v21 }
 0xab0   :  { %v1886_v29 = vadd.f32 %v3730_v10, %v3275_v11  ;;  %v1880_v18 = vpop.f32.mrb[33].mxu0  ;;  %v1913_v4 = vmul.f32 %v5060_v27, %v1713_v21  ;;  %v4202_v21 = vld [vmem:[%s5439_s1 + $0xe0] sm:$0xff] }
 0xab1   :  { %v1881_v12 = vadd.f32 %v3275_v11, %v1880_v18  ;;  %3966 = vmatprep.subr.msk.bf16.mxu1 %vm4394_vm2, %v3964_v5 }
 0xab3   :  { %v3970_v48 = vpack.c.bf16 %v1886_v29, %v1881_v12  ;;  %v3733_v45 = vpop.f32.mrb[34].mxu0  ;;  %v4200_v29 = vld [vmem:[%s5439_s1 + $0xd0] sm:$0xff] }
 0xab4   :  { %v1896_v51 = vadd.f32 %v3733_v45, %v3275_v11  ;;  %v1890_v49 = vpop.f32.mrb[35].mxu0 }
 0xab5   :  { %v1891_v37 = vadd.f32 %v3275_v11, %v1890_v49  ;;  %3971 = vmatprep.subr.bf16.mxu0 %v3970_v48  ;;  %v4199_v11 = vld [vmem:[%s5439_s1 + $0xd8] sm:$0xff] }
 0xab6   :  { %3969 = vmatpush3.bf16.xpose.msk.msra.mxu1 %vm4394_vm2, %v3964_v5  ;;  %3973 = vmatpush3.bf16.msra.mxu0 %v3970_v48 }
 0xab7   :  { %v3974_v0 = vpack.c.bf16 %v1896_v51, %v1891_v37  ;;  %v4201_v37 = vld [vmem:[%s5439_s1 + $0xe8] sm:$0xff] }
 0xab9   :  { %3975 = vmatprep.subr.bf16.mxu0 %v3974_v0 }
 0xaba   :  { %3977 = vmatpush3.bf16.msra.mxu0 %v3974_v0 }
 0xabd   :  { %3743 = vmatmul.mubr.msk.f32.vlgmr.msra.gmra.mrb[36].mxu1 %vm176_vm1, %v1900_v25 }
 0xabe   :  { %3745 = vmatprep.mubr.msk.f32.mxu1 %vm176_vm1, %v1901_v55 }
 0xac1   :  { %3746 = vmatmul.mubr.msk.f32.gmra.mrb[38].mxu1 %vm176_vm1, %v1902_v35 }
 0xac2   :  { %3748 = vmatprep.mubr.msk.f32.mxu1 %vm176_vm1, %v1903_v3 }
 0xac5   :  { %3749 = vmatmul.mubr.msk.f32.gmra.mrb[40].mxu1 %vm176_vm1, %v1904_v33 }
 0xac6   :  { %3751 = vmatprep.mubr.msk.f32.mxu1 %vm176_vm1, %v1905_v17  ;;  %v4203_v17 = vld [vmem:[%s5439_s1 + $0xf8] sm:$0xff] }
 0xac9   :  { %3752 = vmatmul.mubr.msk.f32.gmra.mrb[42].mxu1 %vm176_vm1, %v1906_v39 }
 0xaca   :  { %3754 = vmatprep.mubr.msk.f32.mxu1 %vm176_vm1, %v1907_v53 }
 0xacd   :  { %3755 = vmatmul.mubr.msk.f32.gmra.mrb[44].mxu1 %vm176_vm1, %v1908_v13  ;;  %v4204_v13 = vld [vmem:[%s5439_s1 + $0xf0] sm:$0xff] }
 0xace   :  { %3757 = vmatprep.mubr.msk.f32.mxu1 %vm176_vm1, %v1909_v23 }
 0xad1   :  { %3758 = vmatmul.mubr.msk.f32.gmra.mrb[46].mxu1 %vm176_vm1, %v1910_v52 }
 0xad2   :  { %3760 = vmatprep.mubr.msk.f32.mxu1 %vm176_vm1, %v1911_v61 }
 0xad5   :  { %3761 = vmatmul.mubr.msk.f32.gmra.mrb[48].mxu1 %vm176_vm1, %v1912_v62 }
 0xad6   :  { %3763 = vmatprep.mubr.msk.f32.mxu1 %vm176_vm1, %v1913_v4 }
 0xad9   :  { %3764 = vmatmul.mubr.msk.f32.gmra.mrb[50].mxu1 %vm176_vm1, %v1914_v8 }
 0xb90   :  { %v3744_v1 = vpop.f32.mrb[36].mxu1 }
 0xb91   :  { %v2121_v31 = vmul.f32 0.35355338, %v3744_v1  ;;  %v2041_v6 = vpop.f32.mrb[37].mxu1  ;;  %v4205_v1 = vld [vmem:[%s5439_s1 + $0x108] sm:$0xff] }
 0xb92   :  { %v2120_v7 = vmul.f32 0.35355338, %v2041_v6 }
 0xb93   :  { %v5075_v16 = vadd.f32 %v4197_v28, %v2121_v31 }
 0xb94   :  { %v3747_v9 = vpop.f32.mrb[38].mxu1  ;;  %v5080_v32 = vadd.f32 %v4198_v36, %v2120_v7  ;;  %v4206_v7 = vld [vmem:[%s5439_s1 + $0x100] sm:$0xff] }
 0xb95   :  { %v2123_v41 = vmul.f32 0.35355338, %v3747_v9  ;;  %v2051_v22 = vpop.f32.mrb[39].mxu1  ;;  %v2155_v47 = vsel %vm176_vm1, %v5075_v16, -inf }
 0xb96   :  { %v2122_v58 = vmul.f32 0.35355338, %v2051_v22  ;;  %2156 = vmax.xlane.f32.xlu1 %v2155_v47  ;;  %v2152_v42 = vsel %vm176_vm1, %v5080_v32, -inf }
 0xb97   :  { %2153 = vmax.xlane.f32.xlu0 %v2152_v42  ;;  %v5089_v5 = vadd.f32 %v4199_v11, %v2123_v41 }
 0xb98   :  { %v3750_v10 = vpop.f32.mrb[40].mxu1  ;;  %v5094_v18 = vadd.f32 %v4200_v29, %v2122_v58  ;;  %v4207_v58 = vld [vmem:[%s5439_s1 + $0x118] sm:$0xff] }
 0xb99   :  { %v2125_v12 = vmul.f32 0.35355338, %v3750_v10  ;;  %v2061_v48 = vpop.f32.mrb[41].mxu1  ;;  %v2161_v45 = vsel %vm176_vm1, %v5089_v5, -inf  ;;  %v4208_v10 = vld [vmem:[%s5439_s1 + $0x110] sm:$0xff] }
 0xb9a   :  { %v2124_v51 = vmul.f32 0.35355338, %v2061_v48  ;;  %2162 = vmax.xlane.f32.xlu1 %v2161_v45  ;;  %v2158_v49 = vsel %vm176_vm1, %v5094_v18, -inf }
 0xb9b   :  { %2159 = vmax.xlane.f32.xlu0 %v2158_v49  ;;  %v5103_v34 = vadd.f32 %v4201_v37, %v2125_v12  ;;  %v4209_v37 = vld [vmem:[%s5439_s1 + $0x128] sm:$0xff] }
 0xb9c   :  { %v3753_v0 = vpop.f32.mrb[42].mxu1  ;;  %v5108_v25 = vadd.f32 %v4202_v21, %v2124_v51 }
 0xb9d   :  { %v2127_v44 = vmul.f32 0.35355338, %v3753_v0  ;;  %v2071_v55 = vpop.f32.mrb[43].mxu1  ;;  %v2167_v35 = vsel %vm176_vm1, %v5103_v34, -inf }
 0xb9e   :  { %v2126_v3 = vmul.f32 0.35355338, %v2071_v55  ;;  %2168 = vmax.xlane.f32.xlu1 %v2167_v35  ;;  %v2164_v33 = vsel %vm176_vm1, %v5108_v25, -inf }
 0xb9f   :  { %2165 = vmax.xlane.f32.xlu0 %v2164_v33  ;;  %v5117_v39 = vadd.f32 %v4203_v17, %v2127_v44  ;;  %v4210_v44 = vld [vmem:[%s5439_s1 + $0x120] sm:$0xff] }
 0xba0   :  { %v3756_v53 = vpop.f32.mrb[44].mxu1  ;;  %v5122_v23 = vadd.f32 %v4204_v13, %v2126_v3  ;;  %v4211_v13 = vld [vmem:[%s5439_s1 + $0x138] sm:$0xff] }
 0xba1   :  { %v2129_v52 = vmul.f32 0.35355338, %v3756_v53  ;;  %v2081_v61 = vpop.f32.mrb[45].mxu1  ;;  %v2173_v62 = vsel %vm176_vm1, %v5117_v39, -inf }
 0xba2   :  { %v2128_v4 = vmul.f32 0.35355338, %v2081_v61  ;;  %2174 = vmax.xlane.f32.xlu1 %v2173_v62  ;;  %v2170_v8 = vsel %vm176_vm1, %v5122_v23, -inf  ;;  %v4212_v61 = vld [vmem:[%s5439_s1 + $0x130] sm:$0xff] }
 0xba3   :  { %2171 = vmax.xlane.f32.xlu0 %v2170_v8  ;;  %v5131_v31 = vadd.f32 %v4205_v1, %v2129_v52 }
 0xba4   :  { %v3759_v6 = vpop.f32.mrb[46].mxu1  ;;  %v5136_v28 = vadd.f32 %v4206_v7, %v2128_v4 }
 0xba5   :  { %v2131_v9 = vmul.f32 0.35355338, %v3759_v6  ;;  %v2091_v36 = vpop.f32.mrb[47].mxu1  ;;  %v2179_v41 = vsel %vm176_vm1, %v5131_v31, -inf }
 0xba6   :  { %v2130_v22 = vmul.f32 0.35355338, %v2091_v36  ;;  %2180 = vmax.xlane.f32.xlu1 %v2179_v41  ;;  %v2176_v47 = vsel %vm176_vm1, %v5136_v28, -inf }
 0xba7   :  { %2177 = vmax.xlane.f32.xlu0 %v2176_v47  ;;  %v5145_v42 = vadd.f32 %v4207_v58, %v2131_v9 }
 0xba8   :  { %v3762_v11 = vpop.f32.mrb[48].mxu1  ;;  %v5150_v29 = vadd.f32 %v4208_v10, %v2130_v22 }
 0xba9   :  { %v2133_v12 = vmul.f32 0.35355338, %v3762_v11  ;;  %v2101_v48 = vpop.f32.mrb[49].mxu1  ;;  %v2185_v45 = vsel %vm176_vm1, %v5145_v42, -inf }
 0xbaa   :  { %v2132_v51 = vmul.f32 0.35355338, %v2101_v48  ;;  %2186 = vmax.xlane.f32.xlu1 %v2185_v45  ;;  %v2182_v49 = vsel %vm176_vm1, %v5150_v29, -inf }
 0xbab   :  { %2183 = vmax.xlane.f32.xlu0 %v2182_v49  ;;  %v5159_v0 = vadd.f32 %v4209_v37, %v2133_v12 }
 0xbac   :  { %v3765_v21 = vpop.f32.mrb[50].mxu1  ;;  %v5164_v55 = vadd.f32 %v4210_v44, %v2132_v51 }
 0xbad   :  { %v2135_v35 = vmul.f32 0.35355338, %v3765_v21  ;;  %v2111_v3 = vpop.f32.mrb[51].mxu1  ;;  %v2191_v33 = vsel %vm176_vm1, %v5159_v0, -inf }
 0xbae   :  { %v2134_v17 = vmul.f32 0.35355338, %v2111_v3  ;;  %2192 = vmax.xlane.f32.xlu1 %v2191_v33  ;;  %v2188_v53 = vsel %vm176_vm1, %v5164_v55, -inf }
 0xbaf   :  { %2189 = vmax.xlane.f32.xlu0 %v2188_v53  ;;  %v5173_v52 = vadd.f32 %v4211_v13, %v2135_v35 }
 0xbb0   :  { %v5178_v62 = vadd.f32 %v4212_v61, %v2134_v17 }
 0xbb1   :  { %v2197_v4 = vsel %vm176_vm1, %v5173_v52, -inf }
 0xbb2   :  { %2198 = vmax.xlane.f32.xlu1 %v2197_v4  ;;  %v2194_v8 = vsel %vm176_vm1, %v5178_v62, -inf }
 0xbb3   :  { %2195 = vmax.xlane.f32.xlu0 %v2194_v8 }
 0xc23   :  { %v2157_v1 = vpop.xlane.xlu1 %2156 }
 0xc24   :  { %v2201_v6 = vsub.f32 %v5075_v16, %v2157_v1  ;;  %v2154_v7 = vpop.xlane.xlu0 %2153 }
 0xc25   :  { %v2200_v9 = vsub.f32 %v5080_v32, %v2154_v7 }
 0xc26   :  { %v2218_v36 = vmul.f32 1.442695, %v2201_v6 }
 0xc27   :  { %v2216_v41 = vmul.f32 1.442695, %v2200_v9  ;;  %v2163_v22 = vpop.xlane.xlu1 %2162 }
 0xc28   :  { %4101 = vpow2.f32 %v2218_v36  ;;  %v2203_v47 = vsub.f32 %v5089_v5, %v2163_v22  ;;  %v2160_v58 = vpop.xlane.xlu0 %2159 }
 0xc29   :  { %4103 = vpow2.f32 %v2216_v41  ;;  %v2202_v11 = vsub.f32 %v5094_v18, %v2160_v58 }
 0xc2a   :  { %v2222_v10 = vmul.f32 1.442695, %v2203_v47 }
 0xc2b   :  { %v2220_v12 = vmul.f32 1.442695, %v2202_v11  ;;  %v2169_v48 = vpop.xlane.xlu1 %2168 }
 0xc2c   :  { %4105 = vpow2.f32 %v2222_v10  ;;  %v2205_v45 = vsub.f32 %v5103_v34, %v2169_v48  ;;  %v2166_v16 = vpop.xlane.xlu0 %2165 }
 0xc2d   :  { %4107 = vpow2.f32 %v2220_v12  ;;  %v2204_v32 = vsub.f32 %v5108_v25, %v2166_v16 }
 0xc2e   :  { %v2226_v51 = vmul.f32 1.442695, %v2205_v45 }
 0xc2f   :  { %v2224_v49 = vmul.f32 1.442695, %v2204_v32  ;;  %v2175_v37 = vpop.xlane.xlu1 %2174 }
 0xc30   :  { %4109 = vpow2.f32 %v2226_v51  ;;  %v2207_v5 = vsub.f32 %v5117_v39, %v2175_v37  ;;  %v2172_v21 = vpop.xlane.xlu0 %2171 }
 0xc31   :  { %4111 = vpow2.f32 %v2224_v49  ;;  %v2206_v18 = vsub.f32 %v5122_v23, %v2172_v21 }
 0xc32   :  { %v5192_v44 = vpop.eup %4101  ;;  %v2230_v35 = vmul.f32 1.442695, %v2207_v5 }
 0xc33   :  { %v5194_v3 = vpop.eup %4103  ;;  %v2228_v34 = vmul.f32 1.442695, %v2206_v18  ;;  %v2181_v33 = vpop.xlane.xlu1 %2180  ;;  %v2251_v25 = vsel %vm176_vm1, %v5192_v44, 0.0 }
 0xc34   :  { %4113 = vpow2.f32 %v2230_v35  ;;  %v2209_v17 = vsub.f32 %v5131_v31, %v2181_v33  ;;  %v2178_v53 = vpop.xlane.xlu0 %2177  ;;  %2252 = vadd.xlane.f32.xlu1 %v2251_v25  ;;  %v2248_v39 = vsel %vm176_vm1, %v5194_v3, 0.0 }
 0xc35   :  { %4115 = vpow2.f32 %v2228_v34  ;;  %v2208_v23 = vsub.f32 %v5136_v28, %v2178_v53  ;;  %2249 = vadd.xlane.f32.xlu0 %v2248_v39 }
 0xc36   :  { %v5202_v13 = vpop.eup %4105  ;;  %v2234_v61 = vmul.f32 1.442695, %v2209_v17 }
 0xc37   :  { %v5204_v4 = vpop.eup %4107  ;;  %v2232_v8 = vmul.f32 1.442695, %v2208_v23  ;;  %v2187_v1 = vpop.xlane.xlu1 %2186  ;;  %v2257_v6 = vsel %vm176_vm1, %v5202_v13, 0.0 }
 0xc38   :  { %4117 = vpow2.f32 %v2234_v61  ;;  %v2211_v31 = vsub.f32 %v5145_v42, %v2187_v1  ;;  %v2184_v7 = vpop.xlane.xlu0 %2183  ;;  %2258 = vadd.xlane.f32.xlu1 %v2257_v6  ;;  %v2254_v9 = vsel %vm176_vm1, %v5204_v4, 0.0 }
 0xc39   :  { %4119 = vpow2.f32 %v2232_v8  ;;  %v2210_v28 = vsub.f32 %v5150_v29, %v2184_v7  ;;  %2255 = vadd.xlane.f32.xlu0 %v2254_v9  ;;  %v1598_v9 = vld [vmem:[%s5440_s2 + $0x140] sm:$0xff] }
 0xc3a   :  { %v5212_v36 = vpop.eup %4109  ;;  %v2238_v41 = vmul.f32 1.442695, %v2211_v31 }
 0xc3b   :  { %v5214_v22 = vpop.eup %4111  ;;  %v2236_v47 = vmul.f32 1.442695, %v2210_v28  ;;  %v2193_v58 = vpop.xlane.xlu1 %2192  ;;  %v2263_v11 = vsel %vm176_vm1, %v5212_v36, 0.0  ;;  %v1599_v28 = vld [vmem:[%s5440_s2 + $0x148] sm:$0xff] }
 0xc3c   :  { %4121 = vpow2.f32 %v2238_v41  ;;  %v2213_v42 = vsub.f32 %v5159_v0, %v2193_v58  ;;  %v2190_v10 = vpop.xlane.xlu0 %2189  ;;  %2264 = vadd.xlane.f32.xlu1 %v2263_v11  ;;  %v2260_v12 = vsel %vm176_vm1, %v5214_v22, 0.0  ;;  %v3978_v41 = vpack.c.bf16 %v1599_v28, %v1598_v9 }
 0xc3d   :  { %4123 = vpow2.f32 %v2236_v47  ;;  %v2212_v29 = vsub.f32 %v5164_v55, %v2190_v10  ;;  %2261 = vadd.xlane.f32.xlu0 %v2260_v12 }
 0xc3e   :  { %v5222_v48 = vpop.eup %4113  ;;  %v2242_v45 = vmul.f32 1.442695, %v2213_v42  ;;  %3979 = vmatprep.subr.bf16.mxu0 %v3978_v41 }
 0xc3f   :  { %v5224_v16 = vpop.eup %4115  ;;  %v2240_v32 = vmul.f32 1.442695, %v2212_v29  ;;  %v2199_v51 = vpop.xlane.xlu1 %2198  ;;  %v2269_v49 = vsel %vm176_vm1, %v5222_v48, 0.0 }
 0xc40   :  { %4125 = vpow2.f32 %v2242_v45  ;;  %v2215_v0 = vsub.f32 %v5173_v52, %v2199_v51  ;;  %2270 = vadd.xlane.f32.xlu1 %v2269_v49  ;;  %v2196_v37 = vpop.xlane.xlu0 %2195  ;;  %v2266_v5 = vsel %vm176_vm1, %v5224_v16, 0.0 }
 0xc41   :  { %4127 = vpow2.f32 %v2240_v32  ;;  %v2214_v55 = vsub.f32 %v5178_v62, %v2196_v37  ;;  %2267 = vadd.xlane.f32.xlu0 %v2266_v5 }
 0xc42   :  { %v5232_v21 = vpop.eup %4117  ;;  %v2246_v18 = vmul.f32 1.442695, %v2215_v0 }
 0xc43   :  { %v5234_v35 = vpop.eup %4119  ;;  %v2244_v34 = vmul.f32 1.442695, %v2214_v55  ;;  %v2275_v33 = vsel %vm176_vm1, %v5232_v21, 0.0 }
 0xc44   :  { %4129 = vpow2.f32 %v2246_v18  ;;  %2276 = vadd.xlane.f32.xlu1 %v2275_v33  ;;  %v2272_v52 = vsel %vm176_vm1, %v5234_v35, 0.0 }
 0xc45   :  { %4131 = vpow2.f32 %v2244_v34  ;;  %2273 = vadd.xlane.f32.xlu0 %v2272_v52 }
 0xc46   :  { %v5240_v25 = vpop.eup %4121 }
 0xc47   :  { %v5242_v62 = vpop.eup %4123  ;;  %v2281_v17 = vsel %vm176_vm1, %v5240_v25, 0.0 }
 0xc48   :  { %2282 = vadd.xlane.f32.xlu1 %v2281_v17  ;;  %v2278_v53 = vsel %vm176_vm1, %v5242_v62, 0.0 }
 0xc49   :  { %2279 = vadd.xlane.f32.xlu0 %v2278_v53 }
 0xc4a   :  { %v5248_v39 = vpop.eup %4125 }
 0xc4b   :  { %v5250_v23 = vpop.eup %4127  ;;  %v2287_v61 = vsel %vm176_vm1, %v5248_v39, 0.0 }
 0xc4c   :  { %2288 = vadd.xlane.f32.xlu1 %v2287_v61  ;;  %v2284_v8 = vsel %vm176_vm1, %v5250_v23, 0.0 }
 0xc4d   :  { %2285 = vadd.xlane.f32.xlu0 %v2284_v8 }
 0xc4e   :  { %v5256_v1 = vpop.eup %4129 }
 0xc4f   :  { %v5258_v6 = vpop.eup %4131  ;;  %v2293_v31 = vsel %vm176_vm1, %v5256_v1, 0.0 }
 0xc50   :  { %2294 = vadd.xlane.f32.xlu1 %v2293_v31  ;;  %v2290_v7 = vsel %vm176_vm1, %v5258_v6, 0.0 }
 0xc51   :  { %2291 = vadd.xlane.f32.xlu0 %v2290_v7 }
 0xcc1   :  { %v2253_v47 = vpop.xlane.xlu1 %2252 }
 0xcc2   :  { %4133 = vrcp.f32 %v2253_v47  ;;  %v2250_v58 = vpop.xlane.xlu0 %2249 }
 0xcc3   :  { %4135 = vrcp.f32 %v2250_v58 }
 0xcc5   :  { %v2259_v11 = vpop.xlane.xlu1 %2258 }
 0xcc6   :  { %4137 = vrcp.f32 %v2259_v11  ;;  %v2256_v42 = vpop.xlane.xlu0 %2255 }
 0xcc7   :  { %4139 = vrcp.f32 %v2256_v42 }
 0xcc9   :  { %v2265_v10 = vpop.xlane.xlu1 %2264 }
 0xcca   :  { %4141 = vrcp.f32 %v2265_v10  ;;  %v2262_v12 = vpop.xlane.xlu0 %2261 }
 0xccb   :  { %4143 = vrcp.f32 %v2262_v12 }
 0xccc   :  { %v4134_v29 = vpop.eup %4133 }
 0xccd   :  { %v4136_v45 = vpop.eup %4135  ;;  %v2271_v32 = vpop.xlane.xlu1 %2270  ;;  %v2313_v0 = vmul.f32 %v4134_v29, %v5192_v44 }
 0xcce   :  { %4145 = vrcp.f32 %v2271_v32  ;;  %v2268_v51 = vpop.xlane.xlu0 %2267  ;;  %v2312_v49 = vmul.f32 %v4136_v45, %v5194_v3 }
 0xccf   :  { %4147 = vrcp.f32 %v2268_v51 }
 0xcd0   :  { %v4138_v37 = vpop.eup %4137  ;;  %3774 = vmatprep.mubr.msk.f32.mxu0 %vm176_vm1, %v2312_v49 }
 0xcd1   :  { %v4140_v5 = vpop.eup %4139  ;;  %v2277_v55 = vpop.xlane.xlu1 %2276  ;;  %3775 = vmatmul.mubr.msk.f32.vlgmr.msra.gmra.mrb[36].mxu0 %vm176_vm1, %v2313_v0  ;;  %v2315_v33 = vmul.f32 %v4138_v37, %v5202_v13 }
 0xcd2   :  { %4149 = vrcp.f32 %v2277_v55  ;;  %v2274_v18 = vpop.xlane.xlu0 %2273  ;;  %v2314_v34 = vmul.f32 %v4140_v5, %v5204_v4  ;;  %3981 = vmatpush3.bf16.msra.mxu0 %v3978_v41 }
 0xcd3   :  { %4151 = vrcp.f32 %v2274_v18 }
 0xcd4   :  { %v4142_v52 = vpop.eup %4141  ;;  %3777 = vmatprep.mubr.msk.f32.mxu0 %vm176_vm1, %v2314_v34 }
 0xcd5   :  { %v4144_v44 = vpop.eup %4143  ;;  %v2283_v3 = vpop.xlane.xlu1 %2282  ;;  %3778 = vmatmul.mubr.msk.f32.gmra.mrb[38].mxu0 %vm176_vm1, %v2315_v33  ;;  %v2317_v61 = vmul.f32 %v4142_v52, %v5212_v36 }
 0xcd6   :  { %4153 = vrcp.f32 %v2283_v3  ;;  %v2280_v17 = vpop.xlane.xlu0 %2279  ;;  %v2316_v53 = vmul.f32 %v4144_v44, %v5214_v22 }
 0xcd7   :  { %4155 = vrcp.f32 %v2280_v17 }
 0xcd8   :  { %v4146_v8 = vpop.eup %4145  ;;  %3780 = vmatprep.mubr.msk.f32.mxu0 %vm176_vm1, %v2316_v53 }
 0xcd9   :  { %v4148_v4 = vpop.eup %4147  ;;  %v2289_v31 = vpop.xlane.xlu1 %2288  ;;  %3781 = vmatmul.mubr.msk.f32.gmra.mrb[40].mxu0 %vm176_vm1, %v2317_v61  ;;  %v2319_v9 = vmul.f32 %v4146_v8, %v5222_v48 }
 0xcda   :  { %4157 = vrcp.f32 %v2289_v31  ;;  %v2286_v13 = vpop.xlane.xlu0 %2285  ;;  %v2318_v7 = vmul.f32 %v4148_v4, %v5224_v16 }
 0xcdb   :  { %4159 = vrcp.f32 %v2286_v13 }
 0xcdc   :  { %v4150_v28 = vpop.eup %4149  ;;  %3783 = vmatprep.mubr.msk.f32.mxu0 %vm176_vm1, %v2318_v7 }
 0xcdd   :  { %v4152_v22 = vpop.eup %4151  ;;  %v2295_v41 = vpop.xlane.xlu1 %2294  ;;  %3784 = vmatmul.mubr.msk.f32.gmra.mrb[42].mxu0 %vm176_vm1, %v2319_v9  ;;  %v2321_v58 = vmul.f32 %v4150_v28, %v5232_v21 }
 0xcde   :  { %4161 = vrcp.f32 %v2295_v41  ;;  %v2292_v36 = vpop.xlane.xlu0 %2291  ;;  %v2320_v47 = vmul.f32 %v4152_v22, %v5234_v35 }
 0xcdf   :  { %4163 = vrcp.f32 %v2292_v36 }
 0xce0   :  { %v4154_v11 = vpop.eup %4153  ;;  %3786 = vmatprep.mubr.msk.f32.mxu0 %vm176_vm1, %v2320_v47 }
 0xce1   :  { %v4156_v16 = vpop.eup %4155  ;;  %3787 = vmatmul.mubr.msk.f32.gmra.mrb[44].mxu0 %vm176_vm1, %v2321_v58  ;;  %v2323_v42 = vmul.f32 %v4154_v11, %v5240_v25 }
 0xce2   :  { %v2322_v48 = vmul.f32 %v4156_v16, %v5242_v62 }
 0xce4   :  { %v4158_v10 = vpop.eup %4157  ;;  %3789 = vmatprep.mubr.msk.f32.mxu0 %vm176_vm1, %v2322_v48 }
 0xce5   :  { %v4160_v12 = vpop.eup %4159  ;;  %3790 = vmatmul.mubr.msk.f32.gmra.mrb[46].mxu0 %vm176_vm1, %v2323_v42  ;;  %v2325_v21 = vmul.f32 %v4158_v10, %v5248_v39  ;;  %v1601_v39 = vld [vmem:[%s5440_s2 + $0x158] sm:$0xff] }
 0xce6   :  { %v2324_v35 = vmul.f32 %v4160_v12, %v5250_v23  ;;  %v1600_v23 = vld [vmem:[%s5440_s2 + $0x150] sm:$0xff] }
 0xce7   :  { %v3982_v32 = vpack.c.bf16 %v1601_v39, %v1600_v23 }
 0xce8   :  { %v4162_v29 = vpop.eup %4161  ;;  %3792 = vmatprep.mubr.msk.f32.mxu0 %vm176_vm1, %v2324_v35 }
 0xce9   :  { %v4164_v45 = vpop.eup %4163  ;;  %3793 = vmatmul.mubr.msk.f32.gmra.mrb[48].mxu0 %vm176_vm1, %v2325_v21  ;;  %v2327_v25 = vmul.f32 %v4162_v29, %v5256_v1  ;;  %3983 = vmatprep.subr.bf16.mxu0 %v3982_v32 }
 0xcea   :  { %v2326_v62 = vmul.f32 %v4164_v45, %v5258_v6  ;;  %3985 = vmatpush3.bf16.msra.mxu0 %v3982_v32 }
 0xcec   :  { %3795 = vmatprep.mubr.msk.f32.mxu0 %vm176_vm1, %v2326_v62 }
 0xced   :  { %3796 = vmatmul.mubr.msk.f32.gmra.mrb[50].mxu0 %vm176_vm1, %v2327_v25 }
 0xda4   :  { %v3776_v51 = vpop.f32.mrb[36].mxu0 }
 0xda5   :  { %v2442_v49 = vpop.f32.mrb[37].mxu0  ;;  %v2522_v37 = vmul.f32 %v4967_v43, %v3776_v51  ;;  %v1603_v51 = vld [vmem:[%s5440_s2 + $0x168] sm:$0xff] }
 0xda6   :  { %v2521_v18 = vmul.f32 %v4948_v38, %v2442_v49 }
 0xda8   :  { %v3779_v6 = vpop.f32.mrb[38].mxu0 }
 0xda9   :  { %v2452_v0 = vpop.f32.mrb[39].mxu0  ;;  %v2524_v3 = vmul.f32 %v4981_v57, %v3779_v6 }
 0xdaa   :  { %v2523_v61 = vmul.f32 %v4973_v26, %v2452_v0 }
 0xdac   :  { %v3782_v1 = vpop.f32.mrb[40].mxu0 }
 0xdad   :  { %v2526_v5 = vmul.f32 %v4996_v14, %v3782_v1  ;;  %v2462_v55 = vpop.f32.mrb[41].mxu0 }
 0xdae   :  { %v2525_v34 = vmul.f32 %v4987_v40, %v2462_v55 }
 0xdaf   :  { %v2538_v33 = vadd.f32 %v2526_v5, %v2522_v37 }
 0xdb0   :  { %v2537_v52 = vadd.f32 %v2525_v34, %v2521_v18  ;;  %v3785_v44 = vpop.f32.mrb[42].mxu0 }
 0xdb1   :  { %v2528_v17 = vmul.f32 %v5010_v46, %v3785_v44  ;;  %v2472_v53 = vpop.f32.mrb[43].mxu0 }
 0xdb2   :  { %v2527_v8 = vmul.f32 %v5002_v30, %v2472_v53 }
 0xdb3   :  { %v2540_v43 = vadd.f32 %v2528_v17, %v2524_v3 }
 0xdb4   :  { %v2539_v4 = vadd.f32 %v2527_v8, %v2523_v61  ;;  %v3788_v14 = vpop.f32.mrb[44].mxu0 }
 0xdb5   :  { %v2530_v31 = vmul.f32 %v5025_v56, %v3788_v14  ;;  %v2482_v38 = vpop.f32.mrb[45].mxu0  ;;  %v1604_v14 = vld [vmem:[%s5440_s2 + $0x170] sm:$0xff] }
 0xdb6   :  { %v2529_v40 = vmul.f32 %v5016_v50, %v2482_v38 }
 0xdb7   :  { %v2542_v13 = vadd.f32 %v2538_v33, %v2530_v31  ;;  %v1605_v31 = vld [vmem:[%s5440_s2 + $0x178] sm:$0xff] }
 0xdb8   :  { %v2541_v7 = vadd.f32 %v2537_v52, %v2529_v40  ;;  %v3791_v9 = vpop.f32.mrb[46].mxu0  ;;  %v3990_v38 = vpack.c.bf16 %v1605_v31, %v1604_v14  ;;  %v1606_v40 = vld [vmem:[%s5440_s2 + $0x180] sm:$0xff] }
 0xdb9   :  { %v2532_v57 = vmul.f32 %v5039_v54, %v3791_v9  ;;  %v2492_v28 = vpop.f32.mrb[47].mxu0 }
 0xdba   :  { %v2531_v46 = vmul.f32 %v5031_v60, %v2492_v28 }
 0xdbb   :  { %v2544_v22 = vadd.f32 %v2540_v43, %v2532_v57 }
 0xdbc   :  { %v2543_v26 = vadd.f32 %v2539_v4, %v2531_v46  ;;  %v3794_v41 = vpop.f32.mrb[48].mxu0 }
 0xdbd   :  { %v2534_v30 = vmul.f32 %v5054_v19, %v3794_v41  ;;  %v2502_v36 = vpop.f32.mrb[49].mxu0 }
 0xdbe   :  { %v2533_v47 = vmul.f32 %v5045_v20, %v2502_v36  ;;  %v3316_v20 = vld [vmem:[%s5440_s2 + $0x1a3] ss:$0 sm:$0xff] }
 0xdbf   :  { %v2546_v56 = vadd.f32 %v2542_v13, %v2534_v30  ;;  %v1607_v13 = vld [vmem:[%s5440_s2 + $0x188] sm:$0xff] }
 0xdc0   :  { %v2545_v58 = vadd.f32 %v2541_v7, %v2533_v47  ;;  %v3797_v11 = vpop.f32.mrb[50].mxu0  ;;  %v3994_v7 = vpack.c.bf16 %v1607_v13, %v1606_v40 }
 0xdc1   :  { %v2536_v50 = vmul.f32 %v5068_v24, %v3797_v11  ;;  %v2512_v16 = vpop.f32.mrb[51].mxu0 }
 0xdc2   :  { %v2535_v48 = vmul.f32 %v5060_v27, %v2512_v16  ;;  %3806 = vmatprep.mubr.msk.f32.mxu0 %vm176_vm1, %v2545_v58  ;;  %3995 = vmatprep.subr.bf16.mxu0 %v3994_v7 }
 0xdc3   :  { %v2548_v54 = vadd.f32 %v2544_v22, %v2536_v50  ;;  %3807 = vmatmul.mubr.msk.f32.vlgmr.msra.gmra.mrb[52].mxu0 %vm176_vm1, %v2546_v56  ;;  %v3321_v50 = vld [vmem:[%s5440_s2 + $0x1a6] ss:$0 sm:$0xff] }
 0xdc4   :  { %v2547_v60 = vadd.f32 %v2543_v26, %v2535_v48  ;;  %3997 = vmatpush3.bf16.msra.mxu0 %v3994_v7 }
 0xdc6   :  { %3809 = vmatprep.mubr.msk.f32.mxu0 %vm176_vm1, %v2547_v60  ;;  %v3322_v60 = vld [vmem:[%s5440_s2 + $0x1a7] ss:$0 sm:$0xff] }
 0xdc7   :  { %3810 = vmatmul.mubr.msk.f32.gmra.mrb[54].mxu0 %vm176_vm1, %v2548_v54 }
 0xe96   :  { %v3808_v19 = vpop.f32.mrb[52].mxu0 }
 0xe97   :  { %v2637_v42 = vadd.f32 %v3808_v19, %v3316_v20  ;;  %v2631_v24 = vpop.f32.mrb[53].mxu0 }
 0xe98   :  { %v2632_v10 = vadd.f32 %v3316_v20, %v2631_v24 }
 0xe99   :  { %v2651_v27 = vadd.f32 %v2637_v42, %v4907_v63 }
 0xe9a   :  { %v3811_v12 = vpop.f32.mrb[54].mxu0  ;;  %v2650_v35 = vadd.f32 %v2632_v10, %v4904_v59  ;;  %v1602_v59 = vld [vmem:[%s5440_s2 + $0x160] sm:$0xff] }
 0xe9b   :  { %v2647_v21 = vadd.f32 %v3811_v12, %v3316_v20  ;;  %v2641_v29 = vpop.f32.mrb[55].mxu0  ;;  %v2657_v45 = vsel %vm176_vm1, %v2651_v27, 0.0  ;;  %v3986_v49 = vpack.c.bf16 %v1603_v51, %v1602_v59 }
 0xe9c   :  { %v2642_v62 = vadd.f32 %v3316_v20, %v2641_v29  ;;  %2658 = vadd.xlane.f32.xlu1 %v2657_v45  ;;  %v2654_v25 = vsel %vm176_vm1, %v2650_v35, 0.0 }
 0xe9d   :  { %2655 = vadd.xlane.f32.xlu0 %v2654_v25  ;;  %v2653_v23 = vadd.f32 %v2647_v21, %v4919_v15  ;;  %3987 = vmatprep.subr.bf16.mxu1 %v3986_v49  ;;  %v1608_v25 = vld [vmem:[%s5440_s2 + $0x190] sm:$0xff] }
 0xe9e   :  { %v2652_v39 = vadd.f32 %v2642_v62, %v4917_v2  ;;  %3989 = vmatpush3.bf16.msra.mxu1 %v3986_v49 }
 0xe9f   :  { %v2663_v32 = vsel %vm176_vm1, %v2653_v23, 0.0  ;;  %3991 = vmatprep.subr.bf16.mxu1 %v3990_v38 }
 0xea0   :  { %2664 = vadd.xlane.f32.xlu1 %v2663_v32  ;;  %v2660_v63 = vsel %vm176_vm1, %v2652_v39, 0.0  ;;  %v3323_v32 = vld [vmem:[%s5440_s2 + $0x1a4] ss:$0 sm:$0xff] }
 0xea1   :  { %2661 = vadd.xlane.f32.xlu0 %v2660_v63 }
 0xea2   :  { %3993 = vmatpush3.bf16.msra.mxu1 %v3990_v38 }
 0xf29   :  { %v2659_v15 = vpop.xlane.xlu1 %2658 }
 0xf2a   :  { %v2667_v6 = vmul.f32 0.03125, %v2659_v15  ;;  %v2656_v2 = vpop.xlane.xlu0 %2655 }
 0xf2b   :  { %v2666_v0 = vmul.f32 0.03125, %v2656_v2 }
 0xf2c   :  { %v2671_v1 = vsub.f32 %v2651_v27, %v2667_v6 }
 0xf2d   :  { %v2670_v37 = vsub.f32 %v2650_v35, %v2666_v0  ;;  %v2665_v5 = vpop.xlane.xlu1 %2664 }
 0xf2e   :  { %v2669_v55 = vmul.f32 0.03125, %v2665_v5  ;;  %v2662_v18 = vpop.xlane.xlu0 %2661  ;;  %v2675_v34 = vmul.f32 %v2671_v1, %v2671_v1 }
 0xf2f   :  { %v2668_v33 = vmul.f32 0.03125, %v2662_v18  ;;  %v2674_v52 = vmul.f32 %v2670_v37, %v2670_v37  ;;  %v3328_v18 = vld [vmem:[%s5440_s2 + $0x1a5] ss:$0 sm:$0xff] }
 0xf30   :  { %v2673_v44 = vsub.f32 %v2653_v23, %v2669_v55  ;;  %v2681_v3 = vsel %vm176_vm1, %v2675_v34, 0.0  ;;  %v1609_v23 = vld [vmem:[%s5440_s2 + $0x198] sm:$0xff] }
 0xf31   :  { %v2672_v17 = vsub.f32 %v2652_v39, %v2668_v33  ;;  %2682 = vadd.xlane.f32.xlu1 %v2681_v3  ;;  %v2678_v53 = vsel %vm176_vm1, %v2674_v52, 0.0  ;;  %v3998_v39 = vpack.c.bf16 %v1609_v23, %v1608_v25 }
 0xf32   :  { %2679 = vadd.xlane.f32.xlu0 %v2678_v53  ;;  %v2677_v61 = vmul.f32 %v2673_v44, %v2673_v44 }
 0xf33   :  { %v2676_v8 = vmul.f32 %v2672_v17, %v2672_v17  ;;  %3999 = vmatprep.subr.bf16.mxu0 %v3998_v39 }
 0xf34   :  { %v2687_v43 = vsel %vm176_vm1, %v2677_v61, 0.0  ;;  %4001 = vmatpush3.bf16.msra.mxu0 %v3998_v39 }
 0xf35   :  { %2688 = vadd.xlane.f32.xlu1 %v2687_v43  ;;  %v2684_v4 = vsel %vm176_vm1, %v2676_v8, 0.0 }
 0xf36   :  { %2685 = vadd.xlane.f32.xlu0 %v2684_v4 }
 0xfbe   :  { %v2683_v9 = vpop.xlane.xlu1 %2682 }
 0xfbf   :  { %v2691_v57 = vmul.f32 0.03125, %v2683_v9  ;;  %v2680_v28 = vpop.xlane.xlu0 %2679 }
 0xfc0   :  { %v2690_v46 = vmul.f32 0.03125, %v2680_v28 }
 0xfc1   :  { %v2695_v22 = vadd.f32 1e-05, %v2691_v57 }
 0xfc2   :  { %v2694_v26 = vadd.f32 1e-05, %v2690_v46  ;;  %v2689_v41 = vpop.xlane.xlu1 %2688 }
 0xfc3   :  { %4165 = vrsqrt.f32 %v2695_v22  ;;  %v2693_v30 = vmul.f32 0.03125, %v2689_v41  ;;  %v2686_v36 = vpop.xlane.xlu0 %2685 }
 0xfc4   :  { %4167 = vrsqrt.f32 %v2694_v26  ;;  %v2692_v47 = vmul.f32 0.03125, %v2686_v36 }
 0xfc5   :  { %v2697_v56 = vadd.f32 1e-05, %v2693_v30 }
 0xfc6   :  { %v2696_v58 = vadd.f32 1e-05, %v2692_v47 }
 0xfc7   :  { %4169 = vrsqrt.f32 %v2697_v56 }
 0xfc8   :  { %4171 = vrsqrt.f32 %v2696_v58 }
 0xfcd   :  { %v4166_v11 = vpop.eup %4165 }
 0xfce   :  { %v4168_v16 = vpop.eup %4167  ;;  %v2703_v48 = vmul.f32 %v4166_v11, %v2671_v1 }
 0xfcf   :  { %v2702_v54 = vmul.f32 %v4168_v16, %v2670_v37 }
 0xfd0   :  { %v2711_v20 = vmul.f32 %v3321_v50, %v2703_v48 }
 0xfd1   :  { %v4170_v19 = vpop.eup %4169  ;;  %v2710_v42 = vmul.f32 %v3321_v50, %v2702_v54 }
 0xfd2   :  { %v4172_v24 = vpop.eup %4171  ;;  %v2705_v10 = vmul.f32 %v4170_v19, %v2673_v44  ;;  %v2719_v35 = vadd.f32 %v3322_v60, %v2711_v20  ;;  %v3000_v19 = vld [vmem:[%s5439_s1 + $0x140] sm:$0xff] }
 0xfd3   :  { %v2718_v27 = vadd.f32 %v3322_v60, %v2710_v42  ;;  %v2704_v12 = vmul.f32 %v4172_v24, %v2672_v17  ;;  %v3083_v42 = vld [vmem:[%s5441_s3] sm:$0xff]  ;;  %v3084_v24 = vld [vmem:[%s5441_s3 + $0x8] sm:$0xff] }
 0xfd4   :  { %v2713_v21 = vmul.f32 %v3321_v50, %v2705_v10  ;;  %v3085_v10 = vld [vmem:[%s5441_s3 + $0x10] sm:$0xff] }
 0xfd5   :  { %3820 = vmatprep.mubr.msk.f32.mxu1 %vm176_vm1, %v2718_v27  ;;  %v2712_v29 = vmul.f32 %v3321_v50, %v2704_v12  ;;  %v3086_v12 = vld [vmem:[%s5441_s3 + $0x18] sm:$0xff] }
 0xfd6   :  { %3821 = vmatmul.mubr.msk.f32.vlgmr.msra.gmra.mrb[52].mxu1 %vm176_vm1, %v2719_v35  ;;  %v2721_v62 = vadd.f32 %v3322_v60, %v2713_v21 }
 0xfd7   :  { %v2720_v45 = vadd.f32 %v3322_v60, %v2712_v29 }
 0xfd9   :  { %3823 = vmatprep.mubr.msk.f32.mxu1 %vm176_vm1, %v2720_v45 }
 0xfda   :  { %3824 = vmatmul.mubr.msk.f32.gmra.mrb[54].mxu1 %vm176_vm1, %v2721_v62 }
 0xfdb   :  { %3848 = vmatprep.mubr.msk.f32.mxu1 %vm176_vm1, %v3000_v19 }
0x10a9   :  { %v3822_v63 = vpop.f32.mrb[52].mxu1 }
0x10aa   :  { %v2810_v59 = vadd.f32 %v3822_v63, %v3323_v32  ;;  %v2804_v51 = vpop.f32.mrb[53].mxu1 }
0x10ab   :  { %v2805_v49 = vadd.f32 %v3323_v32, %v2804_v51 }
0x10ac   :  { %v2824_v2 = vmax.f32 %v2810_v59, 0.0 }
0x10ad   :  { %v2823_v15 = vmax.f32 %v2805_v49, 0.0  ;;  %v3825_v6 = vpop.f32.mrb[54].mxu1 }
0x10ae   :  { %v2820_v0 = vadd.f32 %v3825_v6, %v3323_v32  ;;  %v2814_v1 = vpop.f32.mrb[55].mxu1  ;;  %v3333_v6 = vld [vmem:[%s5440_s2 + $0x1a8] ss:$0 sm:$0xff] }
0x10af   :  { %v2815_v37 = vadd.f32 %v3323_v32, %v2814_v1  ;;  %3834 = vmatprep.mubr.msk.f32.mxu0 %vm176_vm1, %v2823_v15  ;;  %v3334_v1 = vld [vmem:[%s5440_s2 + $0x1a9] ss:$0 sm:$0xff] }
0x10b0   :  { %3835 = vmatmul.mubr.msk.f32.vlgmr.msra.gmra.mrb[56].mxu0 %vm176_vm1, %v2824_v2  ;;  %v2826_v55 = vmax.f32 %v2820_v0, 0.0 }
0x10b1   :  { %v2825_v5 = vmax.f32 %v2815_v37, 0.0 }
0x10b3   :  { %3837 = vmatprep.mubr.msk.f32.mxu0 %vm176_vm1, %v2825_v5 }
0x10b4   :  { %3838 = vmatmul.mubr.msk.f32.gmra.mrb[58].mxu0 %vm176_vm1, %v2826_v55 }
0x1183   :  { %v3836_v34 = vpop.f32.mrb[56].mxu0 }
0x1184   :  { %v2915_v33 = vadd.f32 %v3836_v34, %v3328_v18  ;;  %v2909_v52 = vpop.f32.mrb[57].mxu0 }
0x1185   :  { %v2910_v44 = vadd.f32 %v3328_v18, %v2909_v52 }
0x1186   :  { %v2929_v3 = vadd.f32 %v2915_v33, %v2719_v35  ;;  %v4014_v35 = vpack.c.bf16 %v3086_v12, %v3085_v10 }
0x1187   :  { %v3839_v17 = vpop.f32.mrb[58].mxu0  ;;  %v2928_v53 = vadd.f32 %v2910_v44, %v2718_v27  ;;  %v4010_v27 = vpack.c.bf16 %v3084_v24, %v3083_v42 }
0x1188   :  { %v2925_v61 = vadd.f32 %v3839_v17, %v3328_v18  ;;  %v2919_v8 = vpop.f32.mrb[59].mxu0  ;;  %v2935_v43 = vsel %vm176_vm1, %v2929_v3, 0.0 }
0x1189   :  { %v2920_v4 = vadd.f32 %v3328_v18, %v2919_v8  ;;  %2936 = vadd.xlane.f32.xlu1 %v2935_v43  ;;  %v2932_v14 = vsel %vm176_vm1, %v2928_v53, 0.0  ;;  %4011 = vmatprep.subr.bf16.mxu0 %v4010_v27 }
0x118a   :  { %2933 = vadd.xlane.f32.xlu0 %v2932_v14  ;;  %v2931_v31 = vadd.f32 %v2925_v61, %v2721_v62  ;;  %4013 = vmatpush3.bf16.msra.mxu0 %v4010_v27  ;;  %v3001_v14 = vld [vmem:[%s5439_s1 + $0x148] sm:$0xff]  ;;  %s4213_s1 = scalar_lea.vmem %s3181_s24, 256 }
0x118b   :  { %v2930_v38 = vadd.f32 %v2920_v4, %v2720_v45  ;;  %4015 = vmatprep.subr.bf16.mxu0 %v4014_v35  ;;  %p4214_p0 = scmp.ne.s32.totalorder %s3181_s24, %s4213_s1  ;;  %p4219_p2 = scmp.lt.s32.totalorder %s4213_s1, %s4213_s1 }
0x118c   :  { %v2941_v40 = vsel %vm176_vm1, %v2931_v31, 0.0 }
0x118d   :  { %2942 = vadd.xlane.f32.xlu1 %v2941_v40  ;;  %v2938_v13 = vsel %vm176_vm1, %v2930_v38, 0.0  ;;  %v3337_v40 = vld [vmem:[%s5441_s3 + $0x20] ss:$0 sm:$0xff]  ;;  %p4220_p3 = por %p4219_p2, %p4218_p1 }
0x118e   :  { %2939 = vadd.xlane.f32.xlu0 %v2938_v13  ;;  %4017 = vmatpush3.bf16.msra.mxu0 %v4014_v35 }
0x118f   :  { %p4221_p4 = pnand %p4220_p3, %p4214_p0 }
0x1216   :  { %v2937_v7 = vpop.xlane.xlu1 %2936 }
0x1217   :  { %v2945_v9 = vmul.f32 0.03125, %v2937_v7  ;;  %v2934_v57 = vpop.xlane.xlu0 %2933 }
0x1218   :  { %v2944_v28 = vmul.f32 0.03125, %v2934_v57 }
0x1219   :  { %v2949_v46 = vsub.f32 %v2929_v3, %v2945_v9 }
0x121a   :  { %v2948_v22 = vsub.f32 %v2928_v53, %v2944_v28  ;;  %v2943_v26 = vpop.xlane.xlu1 %2942 }
0x121b   :  { %v2947_v41 = vmul.f32 0.03125, %v2943_v26  ;;  %v2940_v30 = vpop.xlane.xlu0 %2939  ;;  %v2953_v36 = vmul.f32 %v2949_v46, %v2949_v46 }
0x121c   :  { %v2946_v47 = vmul.f32 0.03125, %v2940_v30  ;;  %v2952_v56 = vmul.f32 %v2948_v22, %v2948_v22 }
0x121d   :  { %v2951_v58 = vsub.f32 %v2931_v31, %v2947_v41  ;;  %v2959_v11 = vsel %vm176_vm1, %v2953_v36, 0.0 }
0x121e   :  { %v2950_v50 = vsub.f32 %v2930_v38, %v2946_v47  ;;  %2960 = vadd.xlane.f32.xlu1 %v2959_v11  ;;  %v2956_v16 = vsel %vm176_vm1, %v2952_v56, 0.0 }
0x121f   :  { %2957 = vadd.xlane.f32.xlu0 %v2956_v16  ;;  %v2955_v48 = vmul.f32 %v2951_v58, %v2951_v58 }
0x1220   :  { %v2954_v54 = vmul.f32 %v2950_v50, %v2950_v50 }
0x1221   :  { %v2965_v60 = vsel %vm176_vm1, %v2955_v48, 0.0 }
0x1222   :  { %2966 = vadd.xlane.f32.xlu1 %v2965_v60  ;;  %v2962_v20 = vsel %vm176_vm1, %v2954_v54, 0.0 }
0x1223   :  { %2963 = vadd.xlane.f32.xlu0 %v2962_v20 }
0x12ab   :  { %v2961_v21 = vpop.xlane.xlu1 %2960 }
0x12ac   :  { %v2969_v29 = vmul.f32 0.03125, %v2961_v21  ;;  %v2958_v45 = vpop.xlane.xlu0 %2957 }
0x12ad   :  { %v2968_v62 = vmul.f32 0.03125, %v2958_v45 }
0x12ae   :  { %v2973_v25 = vadd.f32 1e-05, %v2969_v29 }
0x12af   :  { %v2972_v23 = vadd.f32 1e-05, %v2968_v62  ;;  %v2967_v39 = vpop.xlane.xlu1 %2966 }
0x12b0   :  { %4173 = vrsqrt.f32 %v2973_v25  ;;  %v2971_v32 = vmul.f32 0.03125, %v2967_v39  ;;  %v2964_v63 = vpop.xlane.xlu0 %2963 }
0x12b1   :  { %4175 = vrsqrt.f32 %v2972_v23  ;;  %v2970_v59 = vmul.f32 0.03125, %v2964_v63 }
0x12b2   :  { %v2975_v51 = vadd.f32 1e-05, %v2971_v32 }
0x12b3   :  { %v2974_v49 = vadd.f32 1e-05, %v2970_v59 }
0x12b4   :  { %4177 = vrsqrt.f32 %v2975_v51 }
0x12b5   :  { %4179 = vrsqrt.f32 %v2974_v49 }
0x12ba   :  { %v4174_v15 = vpop.eup %4173 }
0x12bb   :  { %v4176_v2 = vpop.eup %4175  ;;  %v2981_v0 = vmul.f32 %v4174_v15, %v2949_v46 }
0x12bc   :  { %v2980_v37 = vmul.f32 %v4176_v2, %v2948_v22 }
0x12bd   :  { %v2989_v5 = vmul.f32 %v3333_v6, %v2981_v0 }
0x12be   :  { %v4178_v55 = vpop.eup %4177  ;;  %v2988_v18 = vmul.f32 %v3333_v6, %v2980_v37 }
0x12bf   :  { %v4180_v34 = vpop.eup %4179  ;;  %v2997_v33 = vadd.f32 %v3334_v1, %v2989_v5  ;;  %v2983_v52 = vmul.f32 %v4178_v55, %v2951_v58 }
0x12c0   :  { %v2996_v44 = vadd.f32 %v3334_v1, %v2988_v18  ;;  %v2982_v3 = vmul.f32 %v4180_v34, %v2950_v50 }
0x12c1   :  { %v2991_v17 = vmul.f32 %v3333_v6, %v2983_v52 }
0x12c2   :  { %v4002_v53 = vpack.c.bf16 %v2997_v33, %v2996_v44  ;;  %v2990_v61 = vmul.f32 %v3333_v6, %v2982_v3 }
0x12c3   :  { %v2999_v8 = vadd.f32 %v3334_v1, %v2991_v17 }
0x12c4   :  { %4003 = vmatprep.subr.bf16.mxu1 %v4002_v53  ;;  %v2998_v43 = vadd.f32 %v3334_v1, %v2990_v61 }
0x12c5   :  { %4005 = vmatpush3.bf16.msra.mxu1 %v4002_v53 }
0x12c6   :  { %v4006_v4 = vpack.c.bf16 %v2999_v8, %v2998_v43 }
0x12c8   :  { %4007 = vmatprep.subr.bf16.mxu1 %v4006_v4 }
0x12c9   :  { %4009 = vmatpush3.bf16.msra.mxu1 %v4006_v4 }
0x12cc   :  { %3849 = vmatmul.mubr.msk.f32.vlgmr.msra.gmra.mrb[56].mxu1 %vm176_vm1, %v3001_v14 }
0x139f   :  { %v3850_v31 = vpop.f32.mrb[56].mxu1 }
0x13a0   :  { %v3074_v38 = vpop.f32.mrb[57].mxu1 }
0x13a1   :  { %3859 = vmatprep.mubr.msk.f32.mxu0 %vm176_vm1, %v3074_v38 }
0x13a2   :  { %3860 = vmatmul.mubr.msk.f32.vlgmr.msra.gmra.mrb[60].mxu0 %vm176_vm1, %v3850_v31 }
0x1475   :  { %v3861_v13 = vpop.f32.mrb[60].mxu0 }
0x1476   :  { %v3170_v7 = vadd.f32 %v3861_v13, %v3337_v40  ;;  %v3164_v9 = vpop.f32.mrb[61].mxu0 }
0x1477   :  { %v3165_v57 = vadd.f32 %v3337_v40, %v3164_v9 }
0x1478   :  { %3174 = vst [vmem:[#allocation2 + $0x8] sm:$0xff] %v3170_v7 }
0x1479   :  { %3173 = vst [vmem:[#allocation2] sm:$0xff] %v3165_v57 }
0x147a   :  { %4224 = shalt.err (!%p4221_p4)
}
0x147b   :  { %s4225_s3 = scalar_lea.hbm %s5442_s4, 256 }
0x147c   :  { %p4226_p5 = scmp.ne.s32.totalorder %s5442_s4, %s4225_s3  ;;  %p4229_p6 = scmp.lt.u32.totalorder %s4225_s3, %s5442_s4 }
0x147e   :  { %p4231_p7 = pnand %p4229_p6, %p4226_p5 }
0x1480   :  { %4234 = shalt.err (!%p4231_p7)
}
0x1481   :  { %s4238_s5 = smov 128   ;;  %s4239_s6 = smov 8  }
0x1482   :  { %3186 = dma.vmem_to_hbm [thread:$0]  %s3181_s24, 256, %s5442_s4, [#allocation3], %s4238_s5, %s4238_s5, %s4239_s6  }
0x1483   :  { %4235 = dma.done.wait [#allocation3], 256  }
0x1484   :  { %4236 = vsyncadd [#allocation3], 4294967040 }
0x1485   :  { %3190 = vsyncpa [#allocation3], 1 }

</bundles_post_ra>
